<compile_context>
chip_gen: v6e
topology: v6e:2x2x1
jax: 0.10.0
libtpu: 0.0.40
codegen_flags: <defaults>
</compile_context>

<pallas_src>
import functools

import jax
import jax.numpy as jnp
from jax.experimental import pallas as pl
from jax.experimental.pallas import tpu as pltpu

HP = 128            # lane-padded hidden width (one 128-lane vreg)
NUM_DIRECTIONS = 4  # edge_direction_encoder has 4 embedding rows


# ----------------------------------------------------------------------------
# Fused forward kernel
# ----------------------------------------------------------------------------
def _fused_forward_kernel(
    # index inputs (SMEM, int32, 1-D)
    dirs_ref,      # (E,)   edge_direction
    seb_ref,       # (E,)   simplified_edge_batch
    src_ref,       # (SE,)  simplified_edge_index[0]
    dst_ref,       # (SE,)  simplified_edge_index[1]
    batch_ref,     # (N,)   node -> graph id
    # dense inputs (VMEM, real width, f32)
    x_ref,         # (N, nfeat_node)
    e_ref,         # (E, nfeat_edge)
    # parameters (weights bf16 lane-padded to HP, biases / LN params f32)
    node_w_ref, node_b_ref,
    ea_w1_ref, ea_b1_ref, ea_w2_ref, ea_b2_ref, ea_w3_ref, ea_b3_ref,
    dir_table_ref,                 # (4, HP) f32
    et_w_ref, et_b_ref,
    conv_w_ref, conv_b_ref,        # (L, HP, HP) bf16 / (L, 1, HP) f32
    out_w1_ref, out_b1_ref, out_gamma_ref, out_beta_ref,
    out_w2_ref, out_b2_ref,
    # output
    o_ref,         # (B, HP) f32
    # VMEM scratch
    x_sc,          # (N, HP)  node features across conv layers
    e_sc,          # (E, HP)  combined edge features
    se_sc,         # (SE, HP) simplified edge features
    agg_sc,        # (N, HP)  per-layer scatter-add accumulator
    g_sc,          # (B, HP)  graph readout accumulator
    *, nlayer, nhid, nfeat_edge,
):
    f32, bf16 = jnp.float32, jnp.bfloat16

    def mm(a, w):  # MXU matmul: bf16 inputs, f32 accumulation
        return jnp.dot(a.astype(bf16), w, preferred_element_type=f32)

    n_nodes = x_sc.shape[0]
    n_edges = e_sc.shape[0]
    n_sedges = se_sc.shape[0]

    # ---- node encoder: Linear (no final activation) -------------------------
    x_sc[...] = mm(x_ref[...], node_w_ref[...]) + node_b_ref[...]

    # ---- edge_attr encoder: 3-layer MLP (ReLU, ReLU, none) ------------------
    e_in = e_ref[...]                                        # (E, nfeat_edge) f32
    h = jnp.maximum(mm(e_in, ea_w1_ref[...]) + ea_b1_ref[...], 0.0)
    h = jnp.maximum(mm(h, ea_w2_ref[...]) + ea_b2_ref[...], 0.0)
    h = mm(h, ea_w3_ref[...]) + ea_b3_ref[...]               # (E, HP) f32
    e_sc[...] = h
    # residual (requires nfeat_edge == nhid, as in the original module);
    # masked partial-lane read-modify-write adds the real edge_attr lanes.
    e_sc[:, 0:nfeat_edge] = e_sc[:, 0:nfeat_edge] + e_in

    # ---- scatter-add raw edges -> simplified edges --------------------------
    # Direction embedding (4-row table) is gathered per edge and folded into
    # the same loop; everything in exact f32.
    se_sc[...] = jnp.zeros_like(se_sc)

    @pl.loop(0, n_edges)
    def _(i):
        s = seb_ref[i]
        d = dirs_ref[i]
        row = e_sc[pl.ds(i, 1), :] + dir_table_ref[pl.ds(d, 1), :]
        se_sc[pl.ds(s, 1), :] = se_sc[pl.ds(s, 1), :] + row

    # ---- edge_transform ------------------------------------------------------
    se_sc[...] = mm(se_sc[...], et_w_ref[...]) + et_b_ref[...]

    # ---- GNN conv layers: index-driven gather (src) / scatter-add (dst) -----
    for layer in range(nlayer):
        agg_sc[...] = jnp.zeros_like(agg_sc)

        @pl.loop(0, n_sedges)
        def _(j):
            sidx = src_ref[j]
            didx = dst_ref[j]
            msg = x_sc[pl.ds(sidx, 1), :] * se_sc[pl.ds(j, 1), :]   # x[src]*se (f32)
            agg_sc[pl.ds(didx, 1), :] = agg_sc[pl.ds(didx, 1), :] + msg

        x_sc[...] = jnp.maximum(
            mm(x_sc[...] + agg_sc[...], conv_w_ref[layer]) + conv_b_ref[layer], 0.0)

    # ---- graph readout: scatter-add nodes -> graphs --------------------------
    g_sc[...] = jnp.zeros_like(g_sc)

    @pl.loop(0, n_nodes)
    def _(n):
        b = batch_ref[n]
        g_sc[pl.ds(b, 1), :] = g_sc[pl.ds(b, 1), :] + x_sc[pl.ds(n, 1), :]

    # ---- output encoder: Linear -> LayerNorm (real nhid lanes) -> ReLU -> Linear
    hh = mm(g_sc[...], out_w1_ref[...]) + out_b1_ref[...]    # pad lanes are exactly 0
    lane = jax.lax.broadcasted_iota(jnp.int32, hh.shape, 1)
    mask = (lane < nhid).astype(f32)
    inv_h = 1.0 / float(nhid)
    mu = jnp.sum(hh * mask, axis=-1, keepdims=True) * inv_h
    cent = (hh - mu) * mask
    var = jnp.sum(cent * cent, axis=-1, keepdims=True) * inv_h
    hn = cent * jax.lax.rsqrt(var + 1e-5) * out_gamma_ref[...] + out_beta_ref[...]
    hn = jnp.maximum(hn, 0.0)
    o_ref[...] = mm(hn, out_w2_ref[...]) + out_b2_ref[...]


# ----------------------------------------------------------------------------
# Parameter init / padding
# ----------------------------------------------------------------------------
def init_params(key, nfeat_node, nfeat_edge, nhid, nout, nlayer):
    def lin(k, fi, fo):
        k1, k2 = jax.random.split(k)
        w = jax.random.normal(k1, (fi, fo), jnp.float32) / jnp.sqrt(fi)
        b = jax.random.normal(k2, (1, fo), jnp.float32) * 0.01
        return w, b

    keys = jax.random.split(key, 16)
    p = {}
    p["node_w"], p["node_b"] = lin(keys[0], nfeat_node, nhid)            # node_encoder (1-layer)
    p["ea_w1"], p["ea_b1"] = lin(keys[1], nfeat_edge, nhid)              # edge_attr_encoder (3-layer)
    p["ea_w2"], p["ea_b2"] = lin(keys[2], nhid, nhid)
    p["ea_w3"], p["ea_b3"] = lin(keys[3], nhid, nhid)
    p["dir_table"] = jax.random.normal(keys[4], (NUM_DIRECTIONS, nhid), jnp.float32) * 0.1
    p["et_w"], p["et_b"] = lin(keys[5], nhid, nhid)                      # edge_transform (1-layer)
    for l in range(nlayer):                                              # conv_model layers
        p[f"conv_w{l}"], p[f"conv_b{l}"] = lin(keys[6 + l], nhid, nhid)
    p["out_w1"], p["out_b1"] = lin(keys[10], nhid, nhid)                 # output_encoder (2-layer, LN)
    p["out_gamma"] = jnp.ones((1, nhid), jnp.float32)
    p["out_beta"] = jnp.zeros((1, nhid), jnp.float32)
    p["out_w2"], p["out_b2"] = lin(keys[11], nhid, nout)
    return p


def _pad_cols(a, cols):
    return jnp.pad(a, [(0, 0)] * (a.ndim - 1) + [(0, cols - a.shape[-1])])


def _pad_both(a, rows, cols):
    return jnp.pad(a, ((0, rows - a.shape[0]), (0, cols - a.shape[1])))


def pad_params(p, nlayer):
    bf16 = jnp.bfloat16
    return {
        # input dims stay real-width (x / edge_attr are NOT padded in HBM)
        "node_w": _pad_cols(p["node_w"], HP).astype(bf16),
        "node_b": _pad_cols(p["node_b"], HP),
        "ea_w1": _pad_cols(p["ea_w1"], HP).astype(bf16),
        "ea_b1": _pad_cols(p["ea_b1"], HP),
        "ea_w2": _pad_both(p["ea_w2"], HP, HP).astype(bf16),
        "ea_b2": _pad_cols(p["ea_b2"], HP),
        "ea_w3": _pad_both(p["ea_w3"], HP, HP).astype(bf16),
        "ea_b3": _pad_cols(p["ea_b3"], HP),
        "dir_table": _pad_cols(p["dir_table"], HP),
        "et_w": _pad_both(p["et_w"], HP, HP).astype(bf16),
        "et_b": _pad_cols(p["et_b"], HP),
        "conv_w": jnp.stack([_pad_both(p[f"conv_w{l}"], HP, HP) for l in range(nlayer)]).astype(bf16),
        "conv_b": jnp.stack([_pad_cols(p[f"conv_b{l}"], HP) for l in range(nlayer)]),
        "out_w1": _pad_both(p["out_w1"], HP, HP).astype(bf16),
        "out_b1": _pad_cols(p["out_b1"], HP),
        "out_gamma": _pad_cols(p["out_gamma"], HP),   # zero-padded lanes vanish after LN affine
        "out_beta": _pad_cols(p["out_beta"], HP),
        "out_w2": _pad_both(p["out_w2"], HP, HP).astype(bf16),
        "out_b2": _pad_cols(p["out_b2"], HP),
    }


# ----------------------------------------------------------------------------
# Forward wrapper
# ----------------------------------------------------------------------------
def pallas_forward(pp, data, *, nlayer, nhid, nout, num_simplified_edges, num_graphs):
    x = data["x"].astype(jnp.float32)
    e = data["edge_attr"].astype(jnp.float32)
    n_nodes, _ = x.shape
    n_edges, nfeat_edge = e.shape
    assert nfeat_edge == nhid, "edge residual requires nfeat_edge == nhid"

    dirs = data["edge_direction"].astype(jnp.int32).reshape(n_edges)
    seb = data["simplified_edge_batch"].astype(jnp.int32).reshape(n_edges)
    src = data["simplified_edge_index"][0].astype(jnp.int32).reshape(num_simplified_edges)
    dst = data["simplified_edge_index"][1].astype(jnp.int32).reshape(num_simplified_edges)
    batch = data["batch"].astype(jnp.int32).reshape(n_nodes)

    args = (
        dirs, seb, src, dst, batch, x, e,
        pp["node_w"], pp["node_b"],
        pp["ea_w1"], pp["ea_b1"], pp["ea_w2"], pp["ea_b2"], pp["ea_w3"], pp["ea_b3"],
        pp["dir_table"], pp["et_w"], pp["et_b"],
        pp["conv_w"], pp["conv_b"],
        pp["out_w1"], pp["out_b1"], pp["out_gamma"], pp["out_beta"],
        pp["out_w2"], pp["out_b2"],
    )

    smem_spec = pl.BlockSpec(memory_space=pltpu.MemorySpace.SMEM)
    vmem_spec = pl.BlockSpec(memory_space=pltpu.MemorySpace.VMEM)
    in_specs = [smem_spec] * 5 + [vmem_spec] * (len(args) - 5)

    scratch_shapes = [
        pltpu.VMEM((n_nodes, HP), jnp.float32),               # x_sc
        pltpu.VMEM((n_edges, HP), jnp.float32),                # e_sc
        pltpu.VMEM((num_simplified_edges, HP), jnp.float32),   # se_sc
        pltpu.VMEM((n_nodes, HP), jnp.float32),                # agg_sc
        pltpu.VMEM((num_graphs, HP), jnp.float32),             # g_sc
    ]

    # Explicit VMEM budget (review item): resident footprint + headroom.
    dense_bytes = sum(int(a.size) * a.dtype.itemsize for a in args[5:])
    scratch_bytes = (2 * n_nodes + n_edges + num_simplified_edges + num_graphs) * HP * 4
    out_bytes = num_graphs * HP * 4
    footprint = dense_bytes + scratch_bytes + out_bytes
    vmem_limit = int(min(64 * 1024 * 1024, max(8 * 1024 * 1024, 2 * footprint)))

    # Advisory cost estimate for the XLA scheduler.
    flops = 2 * HP * (
        n_nodes * x.shape[1]                      # node encoder
        + n_edges * nfeat_edge + 2 * n_edges * HP  # edge MLP
        + num_simplified_edges * HP                # edge_transform
        + nlayer * n_nodes * HP                    # conv layers
        + 2 * num_graphs * HP                      # output MLP
    )
    bytes_accessed = sum(int(a.size) * a.dtype.itemsize for a in args) + out_bytes

    out_pad = pl.pallas_call(
        functools.partial(_fused_forward_kernel, nlayer=nlayer, nhid=nhid,
                          nfeat_edge=nfeat_edge),
        out_shape=jax.ShapeDtypeStruct((num_graphs, HP), jnp.float32),
        in_specs=in_specs,
        out_specs=pl.BlockSpec(memory_space=pltpu.MemorySpace.VMEM),
        scratch_shapes=scratch_shapes,
        compiler_params=pltpu.CompilerParams(vmem_limit_bytes=vmem_limit),
        cost_estimate=pl.CostEstimate(flops=flops, transcendentals=num_graphs,
                                      bytes_accessed=bytes_accessed),
    )(*args)
    return out_pad[:, :nout]


# ----------------------------------------------------------------------------
# Pure-JAX reference: exact f32 gather/scatter, bf16-in/f32-acc matmuls
# (same recipe as the kernel).
# ----------------------------------------------------------------------------
def reference_forward(params, data, *, nlayer, num_simplified_edges, num_graphs):
    f32, bf16 = jnp.float32, jnp.bfloat16

    def mm(a, w):
        return jnp.dot(a.astype(bf16), w.astype(bf16), preferred_element_type=f32)

    x = mm(data["x"], params["node_w"]) + params["node_b"]
    e_in = data["edge_attr"]
    h = jnp.maximum(mm(e_in, params["ea_w1"]) + params["ea_b1"], 0.0)
    h = jnp.maximum(mm(h, params["ea_w2"]) + params["ea_b2"], 0.0)
    h = mm(h, params["ea_w3"]) + params["ea_b3"]
    e = e_in + h + params["dir_table"][data["edge_direction"]]

    se = jnp.zeros((num_simplified_edges, e.shape[1]), f32)
    se = se.at[data["simplified_edge_batch"]].add(e)
    se = mm(se, params["et_w"]) + params["et_b"]

    src = data["simplified_edge_index"][0]
    dst = data["simplified_edge_index"][1]
    for l in range(nlayer):
        msg = x[src] * se
        agg = jnp.zeros_like(x).at[dst].add(msg)
        x = jnp.maximum(mm(x + agg, params[f"conv_w{l}"]) + params[f"conv_b{l}"], 0.0)

    g = jnp.zeros((num_graphs, x.shape[1]), f32).at[data["batch"]].add(x)
    hh = mm(g, params["out_w1"]) + params["out_b1"]
    mu = hh.mean(-1, keepdims=True)
    var = ((hh - mu) ** 2).mean(-1, keepdims=True)
    hn = (hh - mu) * jax.lax.rsqrt(var + 1e-5) * params["out_gamma"] + params["out_beta"]
    hn = jnp.maximum(hn, 0.0)
    return mm(hn, params["out_w2"]) + params["out_b2"]


if __name__ == "__main__":
    # Small synthetic multigraph: 2 graphs, 16 nodes, 32 raw edges, 16 simplified edges.
    N, E, SE, B = 16, 32, 16, 2
    NFEAT_NODE, NFEAT_EDGE, NHID, NOUT, NLAYER = 8, 32, 32, 8, 2

    key = jax.random.PRNGKey(0)
    kp, kx, ke, kd, ks, ki = jax.random.split(key, 6)

    params = init_params(kp, NFEAT_NODE, NFEAT_EDGE, NHID, NOUT, NLAYER)
    padded = pad_params(params, NLAYER)

    data = {
        "x": jax.random.normal(kx, (N, NFEAT_NODE), jnp.float32),
        "edge_attr": jax.random.normal(ke, (E, NFEAT_EDGE), jnp.float32),
        "edge_direction": jax.random.randint(kd, (E,), 0, 4, jnp.int32),
        "simplified_edge_batch": jax.random.randint(ks, (E,), 0, SE, jnp.int32),
        "simplified_edge_index": jax.random.randint(ki, (2, SE), 0, N, jnp.int32),
        "batch": jnp.repeat(jnp.arange(B, dtype=jnp.int32), N // B),
    }

    out = pallas_forward(padded, data, nlayer=NLAYER, nhid=NHID, nout=NOUT,
                         num_simplified_edges=SE, num_graphs=B)
    out = jax.block_until_ready(out)

    ref = reference_forward(params, data, nlayer=NLAYER,
                            num_simplified_edges=SE, num_graphs=B)
    ref = jax.block_until_ready(ref)

    assert out.shape == (B, NOUT)
    err = float(jnp.max(jnp.abs(out - ref)))
    assert jnp.allclose(out, ref, rtol=2e-2, atol=2e-2), f"mismatch vs reference (max abs err {err})"
    print("KERNEL_OK")
</pallas_src>

<mosaic_0001>
module attributes {stable_mosaic.version = 11 : i64} {
  func.func @_fused_forward_kernel(%arg0: memref<32xi32, #tpu.memory_space<smem>>, %arg1: memref<32xi32, #tpu.memory_space<smem>>, %arg2: memref<16xi32, #tpu.memory_space<smem>>, %arg3: memref<16xi32, #tpu.memory_space<smem>>, %arg4: memref<16xi32, #tpu.memory_space<smem>>, %arg5: memref<16x8xf32, #tpu.memory_space<vmem>>, %arg6: memref<32x32xf32, #tpu.memory_space<vmem>>, %arg7: memref<8x128xbf16, #tpu.memory_space<vmem>>, %arg8: memref<1x128xf32, #tpu.memory_space<vmem>>, %arg9: memref<32x128xbf16, #tpu.memory_space<vmem>>, %arg10: memref<1x128xf32, #tpu.memory_space<vmem>>, %arg11: memref<128x128xbf16, #tpu.memory_space<vmem>>, %arg12: memref<1x128xf32, #tpu.memory_space<vmem>>, %arg13: memref<128x128xbf16, #tpu.memory_space<vmem>>, %arg14: memref<1x128xf32, #tpu.memory_space<vmem>>, %arg15: memref<4x128xf32, #tpu.memory_space<vmem>>, %arg16: memref<128x128xbf16, #tpu.memory_space<vmem>>, %arg17: memref<1x128xf32, #tpu.memory_space<vmem>>, %arg18: memref<2x128x128xbf16, #tpu.memory_space<vmem>>, %arg19: memref<2x1x128xf32, #tpu.memory_space<vmem>>, %arg20: memref<128x128xbf16, #tpu.memory_space<vmem>>, %arg21: memref<1x128xf32, #tpu.memory_space<vmem>>, %arg22: memref<1x128xf32, #tpu.memory_space<vmem>>, %arg23: memref<1x128xf32, #tpu.memory_space<vmem>>, %arg24: memref<128x128xbf16, #tpu.memory_space<vmem>>, %arg25: memref<1x128xf32, #tpu.memory_space<vmem>>, %arg26: memref<2x128xf32, #tpu.memory_space<vmem>>, %arg27: memref<16x128xf32, #tpu.memory_space<vmem>>, %arg28: memref<32x128xf32, #tpu.memory_space<vmem>>, %arg29: memref<16x128xf32, #tpu.memory_space<vmem>>, %arg30: memref<16x128xf32, #tpu.memory_space<vmem>>, %arg31: memref<2x128xf32, #tpu.memory_space<vmem>>) attributes {dimension_semantics = [], scalar_prefetch = 0 : i64, scratch_operands = 5 : i64, tpu.core_type = #tpu.core_type<tc>} {
    %c0 = arith.constant 0 : index
    %c0_0 = arith.constant 0 : index
    %0 = vector.load %arg5[%c0, %c0_0] : memref<16x8xf32, #tpu.memory_space<vmem>>, vector<16x8xf32>
    %c0_1 = arith.constant 0 : index
    %c0_2 = arith.constant 0 : index
    %1 = vector.load %arg7[%c0_1, %c0_2] : memref<8x128xbf16, #tpu.memory_space<vmem>>, vector<8x128xbf16>
    %2 = arith.truncf %0 : vector<16x8xf32> to vector<16x8xbf16>
    %cst = arith.constant dense<0.000000e+00> : vector<16x128xf32>
    %3 = tpu.matmul %2, %1, %cst {dimension_numbers = #tpu.dot_dimension_numbers<[1], [0], [0], [1], [0, 0, 1, 1], [], []>} : vector<16x8xbf16>, vector<8x128xbf16>, vector<16x128xf32> -> vector<16x128xf32>
    %c0_3 = arith.constant 0 : index
    %c0_4 = arith.constant 0 : index
    %4 = vector.load %arg8[%c0_3, %c0_4] : memref<1x128xf32, #tpu.memory_space<vmem>>, vector<1x128xf32>
    %5 = vector.broadcast %4 : vector<1x128xf32> to vector<16x128xf32>
    %6 = arith.addf %3, %5 : vector<16x128xf32>
    %c0_5 = arith.constant 0 : index
    %c0_6 = arith.constant 0 : index
    %7 = vector.load %arg27[%c0_5, %c0_6] : memref<16x128xf32, #tpu.memory_space<vmem>>, vector<16x128xf32>
    tpu.vector_store %arg27[%c0_5, %c0_6], %6 {strides = array<i32>} : memref<16x128xf32, #tpu.memory_space<vmem>>, vector<16x128xf32>,
    %c0_7 = arith.constant 0 : index
    %c0_8 = arith.constant 0 : index
    %8 = vector.load %arg6[%c0_7, %c0_8] : memref<32x32xf32, #tpu.memory_space<vmem>>, vector<32x32xf32>
    %c0_9 = arith.constant 0 : index
    %c0_10 = arith.constant 0 : index
    %9 = vector.load %arg9[%c0_9, %c0_10] : memref<32x128xbf16, #tpu.memory_space<vmem>>, vector<32x128xbf16>
    %10 = arith.truncf %8 : vector<32x32xf32> to vector<32x32xbf16>
    %cst_11 = arith.constant dense<0.000000e+00> : vector<32x128xf32>
    %11 = tpu.matmul %10, %9, %cst_11 {dimension_numbers = #tpu.dot_dimension_numbers<[1], [0], [0], [1], [0, 0, 1, 1], [], []>} : vector<32x32xbf16>, vector<32x128xbf16>, vector<32x128xf32> -> vector<32x128xf32>
    %c0_12 = arith.constant 0 : index
    %c0_13 = arith.constant 0 : index
    %12 = vector.load %arg10[%c0_12, %c0_13] : memref<1x128xf32, #tpu.memory_space<vmem>>, vector<1x128xf32>
    %13 = vector.broadcast %12 : vector<1x128xf32> to vector<32x128xf32>
    %14 = arith.addf %11, %13 : vector<32x128xf32>
    %cst_14 = arith.constant 0.000000e+00 : f32
    %15 = vector.broadcast %cst_14 : f32 to vector<32x128xf32>
    %16 = arith.maximumf %14, %15 : vector<32x128xf32>
    %c0_15 = arith.constant 0 : index
    %c0_16 = arith.constant 0 : index
    %17 = vector.load %arg11[%c0_15, %c0_16] : memref<128x128xbf16, #tpu.memory_space<vmem>>, vector<128x128xbf16>
    %18 = arith.truncf %16 : vector<32x128xf32> to vector<32x128xbf16>
    %cst_17 = arith.constant dense<0.000000e+00> : vector<32x128xf32>
    %19 = tpu.matmul %18, %17, %cst_17 {dimension_numbers = #tpu.dot_dimension_numbers<[1], [0], [0], [1], [0, 0, 1, 1], [], []>} : vector<32x128xbf16>, vector<128x128xbf16>, vector<32x128xf32> -> vector<32x128xf32>
    %c0_18 = arith.constant 0 : index
    %c0_19 = arith.constant 0 : index
    %20 = vector.load %arg12[%c0_18, %c0_19] : memref<1x128xf32, #tpu.memory_space<vmem>>, vector<1x128xf32>
    %21 = vector.broadcast %20 : vector<1x128xf32> to vector<32x128xf32>
    %22 = arith.addf %19, %21 : vector<32x128xf32>
    %cst_20 = arith.constant 0.000000e+00 : f32
    %23 = vector.broadcast %cst_20 : f32 to vector<32x128xf32>
    %24 = arith.maximumf %22, %23 : vector<32x128xf32>
    %c0_21 = arith.constant 0 : index
    %c0_22 = arith.constant 0 : index
    %25 = vector.load %arg13[%c0_21, %c0_22] : memref<128x128xbf16, #tpu.memory_space<vmem>>, vector<128x128xbf16>
    %26 = arith.truncf %24 : vector<32x128xf32> to vector<32x128xbf16>
    %cst_23 = arith.constant dense<0.000000e+00> : vector<32x128xf32>
    %27 = tpu.matmul %26, %25, %cst_23 {dimension_numbers = #tpu.dot_dimension_numbers<[1], [0], [0], [1], [0, 0, 1, 1], [], []>} : vector<32x128xbf16>, vector<128x128xbf16>, vector<32x128xf32> -> vector<32x128xf32>
    %c0_24 = arith.constant 0 : index
    %c0_25 = arith.constant 0 : index
    %28 = vector.load %arg14[%c0_24, %c0_25] : memref<1x128xf32, #tpu.memory_space<vmem>>, vector<1x128xf32>
    %29 = vector.broadcast %28 : vector<1x128xf32> to vector<32x128xf32>
    %30 = arith.addf %27, %29 : vector<32x128xf32>
    %c0_26 = arith.constant 0 : index
    %c0_27 = arith.constant 0 : index
    %31 = vector.load %arg28[%c0_26, %c0_27] : memref<32x128xf32, #tpu.memory_space<vmem>>, vector<32x128xf32>
    tpu.vector_store %arg28[%c0_26, %c0_27], %30 {strides = array<i32>} : memref<32x128xf32, #tpu.memory_space<vmem>>, vector<32x128xf32>,
    %c0_28 = arith.constant 0 : index
    %c0_29 = arith.constant 0 : index
    %32 = vector.load %arg28[%c0_28, %c0_29] : memref<32x128xf32, #tpu.memory_space<vmem>>, vector<32x32xf32>
    %33 = arith.addf %32, %8 : vector<32x32xf32>
    %c0_30 = arith.constant 0 : index
    %c0_31 = arith.constant 0 : index
    %34 = vector.load %arg28[%c0_30, %c0_31] : memref<32x128xf32, #tpu.memory_space<vmem>>, vector<32x32xf32>
    tpu.vector_store %arg28[%c0_30, %c0_31], %33 {strides = array<i32>} : memref<32x128xf32, #tpu.memory_space<vmem>>, vector<32x32xf32>,
    %cst_32 = arith.constant 0.000000e+00 : f32
    %35 = vector.broadcast %cst_32 : f32 to vector<16x128xf32>
    %c0_33 = arith.constant 0 : index
    %c0_34 = arith.constant 0 : index
    %36 = vector.load %arg29[%c0_33, %c0_34] : memref<16x128xf32, #tpu.memory_space<vmem>>, vector<16x128xf32>
    tpu.vector_store %arg29[%c0_33, %c0_34], %35 {strides = array<i32>} : memref<16x128xf32, #tpu.memory_space<vmem>>, vector<16x128xf32>,
    %c0_i32 = arith.constant 0 : i32
    %c32_i32 = arith.constant 32 : i32
    %37 = arith.addi %c0_i32, %c32_i32 : i32
    %c1_i32 = arith.constant 1 : i32
    scf.for %arg32 = %c0_i32 to %37 step %c1_i32  : i32 {
      %c1_i32_117 = arith.constant 1 : i32
      %128 = arith.muli %arg32, %c1_i32_117 : i32
      %c0_i32_118 = arith.constant 0 : i32
      %129 = arith.addi %c0_i32_118, %128 : i32
      %130 = arith.index_cast %129 : i32 to index
      %131 = memref.load %arg1[%130] : memref<32xi32, #tpu.memory_space<smem>>
      %132 = arith.index_cast %129 : i32 to index
      %133 = memref.load %arg0[%132] : memref<32xi32, #tpu.memory_space<smem>>
      %134 = arith.index_cast %129 : i32 to index
      %c0_119 = arith.constant 0 : index
      %135 = vector.load %arg28[%134, %c0_119] : memref<32x128xf32, #tpu.memory_space<vmem>>, vector<1x128xf32>
      %136 = arith.index_cast %133 : i32 to index
      %c0_120 = arith.constant 0 : index
      %137 = vector.load %arg15[%136, %c0_120] : memref<4x128xf32, #tpu.memory_space<vmem>>, vector<1x128xf32>
      %138 = arith.addf %135, %137 : vector<1x128xf32>
      %139 = arith.index_cast %131 : i32 to index
      %c0_121 = arith.constant 0 : index
      %140 = vector.load %arg29[%139, %c0_121] : memref<16x128xf32, #tpu.memory_space<vmem>>, vector<1x128xf32>
      %141 = arith.addf %140, %138 : vector<1x128xf32>
      %142 = arith.index_cast %131 : i32 to index
      %c0_122 = arith.constant 0 : index
      %143 = vector.load %arg29[%142, %c0_122] : memref<16x128xf32, #tpu.memory_space<vmem>>, vector<1x128xf32>
      tpu.vector_store %arg29[%142, %c0_122], %141 {strides = array<i32>} : memref<16x128xf32, #tpu.memory_space<vmem>>, vector<1x128xf32>,
    }
    %c32_i32_35 = arith.constant 32 : i32
    %c0_36 = arith.constant 0 : index
    %c0_37 = arith.constant 0 : index
    %38 = vector.load %arg29[%c0_36, %c0_37] : memref<16x128xf32, #tpu.memory_space<vmem>>, vector<16x128xf32>
    %c0_38 = arith.constant 0 : index
    %c0_39 = arith.constant 0 : index
    %39 = vector.load %arg16[%c0_38, %c0_39] : memref<128x128xbf16, #tpu.memory_space<vmem>>, vector<128x128xbf16>
    %40 = arith.truncf %38 : vector<16x128xf32> to vector<16x128xbf16>
    %cst_40 = arith.constant dense<0.000000e+00> : vector<16x128xf32>
    %41 = tpu.matmul %40, %39, %cst_40 {dimension_numbers = #tpu.dot_dimension_numbers<[1], [0], [0], [1], [0, 0, 1, 1], [], []>} : vector<16x128xbf16>, vector<128x128xbf16>, vector<16x128xf32> -> vector<16x128xf32>
    %c0_41 = arith.constant 0 : index
    %c0_42 = arith.constant 0 : index
    %42 = vector.load %arg17[%c0_41, %c0_42] : memref<1x128xf32, #tpu.memory_space<vmem>>, vector<1x128xf32>
    %43 = vector.broadcast %42 : vector<1x128xf32> to vector<16x128xf32>
    %44 = arith.addf %41, %43 : vector<16x128xf32>
    %c0_43 = arith.constant 0 : index
    %c0_44 = arith.constant 0 : index
    %45 = vector.load %arg29[%c0_43, %c0_44] : memref<16x128xf32, #tpu.memory_space<vmem>>, vector<16x128xf32>
    tpu.vector_store %arg29[%c0_43, %c0_44], %44 {strides = array<i32>} : memref<16x128xf32, #tpu.memory_space<vmem>>, vector<16x128xf32>,
    %cst_45 = arith.constant 0.000000e+00 : f32
    %46 = vector.broadcast %cst_45 : f32 to vector<16x128xf32>
    %c0_46 = arith.constant 0 : index
    %c0_47 = arith.constant 0 : index
    %47 = vector.load %arg30[%c0_46, %c0_47] : memref<16x128xf32, #tpu.memory_space<vmem>>, vector<16x128xf32>
    tpu.vector_store %arg30[%c0_46, %c0_47], %46 {strides = array<i32>} : memref<16x128xf32, #tpu.memory_space<vmem>>, vector<16x128xf32>,
    %c0_i32_48 = arith.constant 0 : i32
    %c16_i32 = arith.constant 16 : i32
    %48 = arith.addi %c0_i32_48, %c16_i32 : i32
    %c1_i32_49 = arith.constant 1 : i32
    scf.for %arg32 = %c0_i32_48 to %48 step %c1_i32_49  : i32 {
      %c1_i32_117 = arith.constant 1 : i32
      %128 = arith.muli %arg32, %c1_i32_117 : i32
      %c0_i32_118 = arith.constant 0 : i32
      %129 = arith.addi %c0_i32_118, %128 : i32
      %130 = arith.index_cast %129 : i32 to index
      %131 = memref.load %arg2[%130] : memref<16xi32, #tpu.memory_space<smem>>
      %132 = arith.index_cast %129 : i32 to index
      %133 = memref.load %arg3[%132] : memref<16xi32, #tpu.memory_space<smem>>
      %134 = arith.index_cast %131 : i32 to index
      %c0_119 = arith.constant 0 : index
      %135 = vector.load %arg27[%134, %c0_119] : memref<16x128xf32, #tpu.memory_space<vmem>>, vector<1x128xf32>
      %136 = arith.index_cast %129 : i32 to index
      %c0_120 = arith.constant 0 : index
      %137 = vector.load %arg29[%136, %c0_120] : memref<16x128xf32, #tpu.memory_space<vmem>>, vector<1x128xf32>
      %138 = arith.mulf %135, %137 : vector<1x128xf32>
      %139 = arith.index_cast %133 : i32 to index
      %c0_121 = arith.constant 0 : index
      %140 = vector.load %arg30[%139, %c0_121] : memref<16x128xf32, #tpu.memory_space<vmem>>, vector<1x128xf32>
      %141 = arith.addf %140, %138 : vector<1x128xf32>
      %142 = arith.index_cast %133 : i32 to index
      %c0_122 = arith.constant 0 : index
      %143 = vector.load %arg30[%142, %c0_122] : memref<16x128xf32, #tpu.memory_space<vmem>>, vector<1x128xf32>
      tpu.vector_store %arg30[%142, %c0_122], %141 {strides = array<i32>} : memref<16x128xf32, #tpu.memory_space<vmem>>, vector<1x128xf32>,
    }
    %c16_i32_50 = arith.constant 16 : i32
    %c0_51 = arith.constant 0 : index
    %c0_52 = arith.constant 0 : index
    %49 = vector.load %arg27[%c0_51, %c0_52] : memref<16x128xf32, #tpu.memory_space<vmem>>, vector<16x128xf32>
    %c0_53 = arith.constant 0 : index
    %c0_54 = arith.constant 0 : index
    %50 = vector.load %arg30[%c0_53, %c0_54] : memref<16x128xf32, #tpu.memory_space<vmem>>, vector<16x128xf32>
    %51 = arith.addf %49, %50 : vector<16x128xf32>
    %c0_55 = arith.constant 0 : index
    %c0_56 = arith.constant 0 : index
    %c0_57 = arith.constant 0 : index
    %52 = vector.load %arg18[%c0_55, %c0_56, %c0_57] : memref<2x128x128xbf16, #tpu.memory_space<vmem>>, vector<1x128x128xbf16>
    %53 = vector.shape_cast %52 : vector<1x128x128xbf16> to vector<128x128xbf16>
    %54 = arith.truncf %51 : vector<16x128xf32> to vector<16x128xbf16>
    %cst_58 = arith.constant dense<0.000000e+00> : vector<16x128xf32>
    %55 = tpu.matmul %54, %53, %cst_58 {dimension_numbers = #tpu.dot_dimension_numbers<[1], [0], [0], [1], [0, 0, 1, 1], [], []>} : vector<16x128xbf16>, vector<128x128xbf16>, vector<16x128xf32> -> vector<16x128xf32>
    %c0_59 = arith.constant 0 : index
    %c0_60 = arith.constant 0 : index
    %c0_61 = arith.constant 0 : index
    %56 = vector.load %arg19[%c0_59, %c0_60, %c0_61] : memref<2x1x128xf32, #tpu.memory_space<vmem>>, vector<1x1x128xf32>
    %57 = vector.shape_cast %56 : vector<1x1x128xf32> to vector<1x128xf32>
    %58 = vector.broadcast %57 : vector<1x128xf32> to vector<16x128xf32>
    %59 = arith.addf %55, %58 : vector<16x128xf32>
    %cst_62 = arith.constant 0.000000e+00 : f32
    %60 = vector.broadcast %cst_62 : f32 to vector<16x128xf32>
    %61 = arith.maximumf %59, %60 : vector<16x128xf32>
    %c0_63 = arith.constant 0 : index
    %c0_64 = arith.constant 0 : index
    %62 = vector.load %arg27[%c0_63, %c0_64] : memref<16x128xf32, #tpu.memory_space<vmem>>, vector<16x128xf32>
    tpu.vector_store %arg27[%c0_63, %c0_64], %61 {strides = array<i32>} : memref<16x128xf32, #tpu.memory_space<vmem>>, vector<16x128xf32>,
    %cst_65 = arith.constant 0.000000e+00 : f32
    %63 = vector.broadcast %cst_65 : f32 to vector<16x128xf32>
    %c0_66 = arith.constant 0 : index
    %c0_67 = arith.constant 0 : index
    %64 = vector.load %arg30[%c0_66, %c0_67] : memref<16x128xf32, #tpu.memory_space<vmem>>, vector<16x128xf32>
    tpu.vector_store %arg30[%c0_66, %c0_67], %63 {strides = array<i32>} : memref<16x128xf32, #tpu.memory_space<vmem>>, vector<16x128xf32>,
    %c0_i32_68 = arith.constant 0 : i32
    %c16_i32_69 = arith.constant 16 : i32
    %65 = arith.addi %c0_i32_68, %c16_i32_69 : i32
    %c1_i32_70 = arith.constant 1 : i32
    scf.for %arg32 = %c0_i32_68 to %65 step %c1_i32_70  : i32 {
      %c1_i32_117 = arith.constant 1 : i32
      %128 = arith.muli %arg32, %c1_i32_117 : i32
      %c0_i32_118 = arith.constant 0 : i32
      %129 = arith.addi %c0_i32_118, %128 : i32
      %130 = arith.index_cast %129 : i32 to index
      %131 = memref.load %arg2[%130] : memref<16xi32, #tpu.memory_space<smem>>
      %132 = arith.index_cast %129 : i32 to index
      %133 = memref.load %arg3[%132] : memref<16xi32, #tpu.memory_space<smem>>
      %134 = arith.index_cast %131 : i32 to index
      %c0_119 = arith.constant 0 : index
      %135 = vector.load %arg27[%134, %c0_119] : memref<16x128xf32, #tpu.memory_space<vmem>>, vector<1x128xf32>
      %136 = arith.index_cast %129 : i32 to index
      %c0_120 = arith.constant 0 : index
      %137 = vector.load %arg29[%136, %c0_120] : memref<16x128xf32, #tpu.memory_space<vmem>>, vector<1x128xf32>
      %138 = arith.mulf %135, %137 : vector<1x128xf32>
      %139 = arith.index_cast %133 : i32 to index
      %c0_121 = arith.constant 0 : index
      %140 = vector.load %arg30[%139, %c0_121] : memref<16x128xf32, #tpu.memory_space<vmem>>, vector<1x128xf32>
      %141 = arith.addf %140, %138 : vector<1x128xf32>
      %142 = arith.index_cast %133 : i32 to index
      %c0_122 = arith.constant 0 : index
      %143 = vector.load %arg30[%142, %c0_122] : memref<16x128xf32, #tpu.memory_space<vmem>>, vector<1x128xf32>
      tpu.vector_store %arg30[%142, %c0_122], %141 {strides = array<i32>} : memref<16x128xf32, #tpu.memory_space<vmem>>, vector<1x128xf32>,
    }
    %c16_i32_71 = arith.constant 16 : i32
    %c0_72 = arith.constant 0 : index
    %c0_73 = arith.constant 0 : index
    %66 = vector.load %arg27[%c0_72, %c0_73] : memref<16x128xf32, #tpu.memory_space<vmem>>, vector<16x128xf32>
    %c0_74 = arith.constant 0 : index
    %c0_75 = arith.constant 0 : index
    %67 = vector.load %arg30[%c0_74, %c0_75] : memref<16x128xf32, #tpu.memory_space<vmem>>, vector<16x128xf32>
    %68 = arith.addf %66, %67 : vector<16x128xf32>
    %c1 = arith.constant 1 : index
    %c0_76 = arith.constant 0 : index
    %c0_77 = arith.constant 0 : index
    %69 = vector.load %arg18[%c1, %c0_76, %c0_77] : memref<2x128x128xbf16, #tpu.memory_space<vmem>>, vector<1x128x128xbf16>
    %70 = vector.shape_cast %69 : vector<1x128x128xbf16> to vector<128x128xbf16>
    %71 = arith.truncf %68 : vector<16x128xf32> to vector<16x128xbf16>
    %cst_78 = arith.constant dense<0.000000e+00> : vector<16x128xf32>
    %72 = tpu.matmul %71, %70, %cst_78 {dimension_numbers = #tpu.dot_dimension_numbers<[1], [0], [0], [1], [0, 0, 1, 1], [], []>} : vector<16x128xbf16>, vector<128x128xbf16>, vector<16x128xf32> -> vector<16x128xf32>
    %c1_79 = arith.constant 1 : index
    %c0_80 = arith.constant 0 : index
    %c0_81 = arith.constant 0 : index
    %73 = vector.load %arg19[%c1_79, %c0_80, %c0_81] : memref<2x1x128xf32, #tpu.memory_space<vmem>>, vector<1x1x128xf32>
    %74 = vector.shape_cast %73 : vector<1x1x128xf32> to vector<1x128xf32>
    %75 = vector.broadcast %74 : vector<1x128xf32> to vector<16x128xf32>
    %76 = arith.addf %72, %75 : vector<16x128xf32>
    %cst_82 = arith.constant 0.000000e+00 : f32
    %77 = vector.broadcast %cst_82 : f32 to vector<16x128xf32>
    %78 = arith.maximumf %76, %77 : vector<16x128xf32>
    %c0_83 = arith.constant 0 : index
    %c0_84 = arith.constant 0 : index
    %79 = vector.load %arg27[%c0_83, %c0_84] : memref<16x128xf32, #tpu.memory_space<vmem>>, vector<16x128xf32>
    tpu.vector_store %arg27[%c0_83, %c0_84], %78 {strides = array<i32>} : memref<16x128xf32, #tpu.memory_space<vmem>>, vector<16x128xf32>,
    %cst_85 = arith.constant 0.000000e+00 : f32
    %80 = vector.broadcast %cst_85 : f32 to vector<2x128xf32>
    %c0_86 = arith.constant 0 : index
    %c0_87 = arith.constant 0 : index
    %81 = vector.load %arg31[%c0_86, %c0_87] : memref<2x128xf32, #tpu.memory_space<vmem>>, vector<2x128xf32>
    tpu.vector_store %arg31[%c0_86, %c0_87], %80 {strides = array<i32>} : memref<2x128xf32, #tpu.memory_space<vmem>>, vector<2x128xf32>,
    %c0_i32_88 = arith.constant 0 : i32
    %c16_i32_89 = arith.constant 16 : i32
    %82 = arith.addi %c0_i32_88, %c16_i32_89 : i32
    %c1_i32_90 = arith.constant 1 : i32
    scf.for %arg32 = %c0_i32_88 to %82 step %c1_i32_90  : i32 {
      %c1_i32_117 = arith.constant 1 : i32
      %128 = arith.muli %arg32, %c1_i32_117 : i32
      %c0_i32_118 = arith.constant 0 : i32
      %129 = arith.addi %c0_i32_118, %128 : i32
      %130 = arith.index_cast %129 : i32 to index
      %131 = memref.load %arg4[%130] : memref<16xi32, #tpu.memory_space<smem>>
      %132 = arith.index_cast %131 : i32 to index
      %c0_119 = arith.constant 0 : index
      %133 = vector.load %arg31[%132, %c0_119] : memref<2x128xf32, #tpu.memory_space<vmem>>, vector<1x128xf32>
      %134 = arith.index_cast %129 : i32 to index
      %c0_120 = arith.constant 0 : index
      %135 = vector.load %arg27[%134, %c0_120] : memref<16x128xf32, #tpu.memory_space<vmem>>, vector<1x128xf32>
      %136 = arith.addf %133, %135 : vector<1x128xf32>
      %137 = arith.index_cast %131 : i32 to index
      %c0_121 = arith.constant 0 : index
      %138 = vector.load %arg31[%137, %c0_121] : memref<2x128xf32, #tpu.memory_space<vmem>>, vector<1x128xf32>
      tpu.vector_store %arg31[%137, %c0_121], %136 {strides = array<i32>} : memref<2x128xf32, #tpu.memory_space<vmem>>, vector<1x128xf32>,
    }
    %c16_i32_91 = arith.constant 16 : i32
    %c0_92 = arith.constant 0 : index
    %c0_93 = arith.constant 0 : index
    %83 = vector.load %arg31[%c0_92, %c0_93] : memref<2x128xf32, #tpu.memory_space<vmem>>, vector<2x128xf32>
    %c0_94 = arith.constant 0 : index
    %c0_95 = arith.constant 0 : index
    %84 = vector.load %arg20[%c0_94, %c0_95] : memref<128x128xbf16, #tpu.memory_space<vmem>>, vector<128x128xbf16>
    %85 = arith.truncf %83 : vector<2x128xf32> to vector<2x128xbf16>
    %cst_96 = arith.constant dense<0.000000e+00> : vector<2x128xf32>
    %86 = tpu.matmul %85, %84, %cst_96 {dimension_numbers = #tpu.dot_dimension_numbers<[1], [0], [0], [1], [0, 0, 1, 1], [], []>} : vector<2x128xbf16>, vector<128x128xbf16>, vector<2x128xf32> -> vector<2x128xf32>
    %c0_97 = arith.constant 0 : index
    %c0_98 = arith.constant 0 : index
    %87 = vector.load %arg21[%c0_97, %c0_98] : memref<1x128xf32, #tpu.memory_space<vmem>>, vector<1x128xf32>
    %88 = vector.broadcast %87 : vector<1x128xf32> to vector<2x128xf32>
    %89 = arith.addf %86, %88 : vector<2x128xf32>
    %90 = tpu.iota {dimensions = array<i32: 1>} : vector<2x128xi32>
    %c32_i32_99 = arith.constant 32 : i32
    %91 = vector.broadcast %c32_i32_99 : i32 to vector<2x128xi32>
    %92 = arith.cmpi slt, %90, %91 : vector<2x128xi32>
    %93 = arith.extui %92 : vector<2x128xi1> to vector<2x128xi32>
    %94 = arith.sitofp %93 : vector<2x128xi32> to vector<2x128xf32>
    %95 = arith.mulf %89, %94 : vector<2x128xf32>
    %cst_100 = arith.constant dense<0.000000e+00> : vector<2xf32>
    %96 = vector.multi_reduction <add>, %95, %cst_100 [1] : vector<2x128xf32> to vector<2xf32>
    %97 = vector.shape_cast %96 : vector<2xf32> to vector<2x1xf32>
    %cst_101 = arith.constant 3.125000e-02 : f32
    %98 = vector.broadcast %cst_101 : f32 to vector<2x1xf32>
    %99 = arith.mulf %97, %98 : vector<2x1xf32>
    %100 = vector.broadcast %99 : vector<2x1xf32> to vector<2x128xf32>
    %101 = arith.subf %89, %100 : vector<2x128xf32>
    %102 = arith.mulf %101, %94 : vector<2x128xf32>
    %103 = arith.mulf %102, %102 : vector<2x128xf32>
    %cst_102 = arith.constant dense<0.000000e+00> : vector<2xf32>
    %104 = vector.multi_reduction <add>, %103, %cst_102 [1] : vector<2x128xf32> to vector<2xf32>
    %105 = vector.shape_cast %104 : vector<2xf32> to vector<2x1xf32>
    %cst_103 = arith.constant 3.125000e-02 : f32
    %106 = vector.broadcast %cst_103 : f32 to vector<2x1xf32>
    %107 = arith.mulf %105, %106 : vector<2x1xf32>
    %cst_104 = arith.constant 9.99999974E-6 : f32
    %108 = vector.broadcast %cst_104 : f32 to vector<2x1xf32>
    %109 = arith.addf %107, %108 : vector<2x1xf32>
    %110 = math.rsqrt %109 : vector<2x1xf32>
    %111 = vector.broadcast %110 : vector<2x1xf32> to vector<2x128xf32>
    %112 = arith.mulf %102, %111 : vector<2x128xf32>
    %c0_105 = arith.constant 0 : index
    %c0_106 = arith.constant 0 : index
    %113 = vector.load %arg22[%c0_105, %c0_106] : memref<1x128xf32, #tpu.memory_space<vmem>>, vector<1x128xf32>
    %114 = vector.broadcast %113 : vector<1x128xf32> to vector<2x128xf32>
    %115 = arith.mulf %112, %114 : vector<2x128xf32>
    %c0_107 = arith.constant 0 : index
    %c0_108 = arith.constant 0 : index
    %116 = vector.load %arg23[%c0_107, %c0_108] : memref<1x128xf32, #tpu.memory_space<vmem>>, vector<1x128xf32>
    %117 = vector.broadcast %116 : vector<1x128xf32> to vector<2x128xf32>
    %118 = arith.addf %115, %117 : vector<2x128xf32>
    %cst_109 = arith.constant 0.000000e+00 : f32
    %119 = vector.broadcast %cst_109 : f32 to vector<2x128xf32>
    %120 = arith.maximumf %118, %119 : vector<2x128xf32>
    %c0_110 = arith.constant 0 : index
    %c0_111 = arith.constant 0 : index
    %121 = vector.load %arg24[%c0_110, %c0_111] : memref<128x128xbf16, #tpu.memory_space<vmem>>, vector<128x128xbf16>
    %122 = arith.truncf %120 : vector<2x128xf32> to vector<2x128xbf16>
    %cst_112 = arith.constant dense<0.000000e+00> : vector<2x128xf32>
    %123 = tpu.matmul %122, %121, %cst_112 {dimension_numbers = #tpu.dot_dimension_numbers<[1], [0], [0], [1], [0, 0, 1, 1], [], []>} : vector<2x128xbf16>, vector<128x128xbf16>, vector<2x128xf32> -> vector<2x128xf32>
    %c0_113 = arith.constant 0 : index
    %c0_114 = arith.constant 0 : index
    %124 = vector.load %arg25[%c0_113, %c0_114] : memref<1x128xf32, #tpu.memory_space<vmem>>, vector<1x128xf32>
    %125 = vector.broadcast %124 : vector<1x128xf32> to vector<2x128xf32>
    %126 = arith.addf %123, %125 : vector<2x128xf32>
    %c0_115 = arith.constant 0 : index
    %c0_116 = arith.constant 0 : index
    %127 = vector.load %arg26[%c0_115, %c0_116] : memref<2x128xf32, #tpu.memory_space<vmem>>, vector<2x128xf32>
    tpu.vector_store %arg26[%c0_115, %c0_116], %126 {strides = array<i32>} : memref<2x128xf32, #tpu.memory_space<vmem>>, vector<2x128xf32>,
    return
  }
}

</mosaic_0001>

<bundles_post_ra>
// kernel: tpu_custom_call.1
= control target key start
LH: loop header
LB: loop body
LE: loop exit
PB: predicated region body
PF: predicated region fallthrough
CT: control target
= control target key end

     0   :  { %s2777_s0 = inlined_call_operand.vmem [shape: s32[32], index: 0, kind: input, shape index: {}]   ;;  %s2778_s1 = inlined_call_operand.hbm [shape: s32[32], index: 1, kind: input, shape index: {}]   ;;  %s2779_s2 = inlined_call_operand.hbm [shape: s32[16], index: 2, kind: input, shape index: {}]   ;;  %s2780_s3 = inlined_call_operand.hbm [shape: s32[16], index: 3, kind: input, shape index: {}]   ;;  %s2781_s4 = inlined_call_operand.hbm [shape: s32[16], index: 4, kind: input, shape index: {}]   ;;  %s2782_s5 = inlined_call_operand.vmem [shape: f32[16,8], index: 5, kind: input, shape index: {}]   ;;  %s2783_s6 = inlined_call_operand.hbm [shape: f32[32,32], index: 6, kind: input, shape index: {}]   ;;  %s2784_s7 = inlined_call_operand.hbm [shape: bf16[8,128], index: 7, kind: input, shape index: {}]   ;;  %s2785_s8 = inlined_call_operand.hbm [shape: f32[1,128], index: 8, kind: input, shape index: {}]   ;;  %s2786_s9 = inlined_call_operand.hbm [shape: bf16[32,128], index: 9, kind: input, shape index: {}]   ;;  %s2787_s10 = inlined_call_operand.hbm [shape: f32[1,128], index: 10, kind: input, shape index: {}]   ;;  %s2788_s11 = inlined_call_operand.hbm [shape: bf16[128,128], index: 11, kind: input, shape index: {}]   ;;  %s2789_s12 = inlined_call_operand.hbm [shape: f32[1,128], index: 12, kind: input, shape index: {}]   ;;  %s2790_s13 = inlined_call_operand.hbm [shape: bf16[128,128], index: 13, kind: input, shape index: {}]   ;;  %s2791_s14 = inlined_call_operand.hbm [shape: f32[1,128], index: 14, kind: input, shape index: {}]   ;;  %s2792_s15 = inlined_call_operand.hbm [shape: f32[4,128], index: 15, kind: input, shape index: {}]   ;;  %s2793_s16 = inlined_call_operand.hbm [shape: bf16[128,128], index: 16, kind: input, shape index: {}]   ;;  %s2794_s17 = inlined_call_operand.hbm [shape: f32[1,128], index: 17, kind: input, shape index: {}]   ;;  %s2795_s18 = inlined_call_operand.hbm [shape: bf16[2,128,128], index: 18, kind: input, shape index: {}]   ;;  %s2796_s19 = inlined_call_operand.vmem [shape: f32[2,1,128], index: 19, kind: input, shape index: {}]   ;;  %s2797_s20 = inlined_call_operand.hbm [shape: bf16[128,128], index: 20, kind: input, shape index: {}]   ;;  %s2798_s21 = inlined_call_operand.hbm [shape: f32[1,128], index: 21, kind: input, shape index: {}]   ;;  %s2799_s22 = inlined_call_operand.hbm [shape: f32[1,128], index: 22, kind: input, shape index: {}]   ;;  %s2800_s23 = inlined_call_operand.hbm [shape: f32[1,128], index: 23, kind: input, shape index: {}]   ;;  %s2801_s24 = inlined_call_operand.vmem [shape: bf16[128,128], index: 24, kind: input, shape index: {}]   ;;  %s2802_s25 = inlined_call_operand.vmem [shape: f32[1,128], index: 25, kind: input, shape index: {}]   ;;  %s2803_s26 = inlined_call_operand.hbm [shape: f32[2,128], index: 26, kind: output, shape index: {}]  }
   0x1   :  { %2805 = sst [smem:[#allocation58_spill]] %s2777_s0 }
   0x2   :  { %2806 = sst [smem:[#allocation59_spill]] %s2778_s1 }
   0x3   :  { %2807 = sst [smem:[#allocation60_spill]] %s2779_s2 }
   0x4   :  { %2808 = sst [smem:[#allocation61_spill]] %s2780_s3 }
   0x5   :  { %2809 = sst [smem:[#allocation62_spill]] %s2781_s4 }
   0x6   :  { %2810 = sst [smem:[#allocation63_spill]] %s2782_s5 }
   0x7   :  { %2811 = sst [smem:[#allocation64_spill]] %s2783_s6 }
   0x8   :  { %2812 = sst [smem:[#allocation65_spill]] %s2784_s7 }
   0x9   :  { %2813 = sst [smem:[#allocation66_spill]] %s2785_s8 }
   0xa   :  { %2814 = sst [smem:[#allocation67_spill]] %s2786_s9 }
   0xb   :  { %2815 = sst [smem:[#allocation68_spill]] %s2787_s10 }
   0xc   :  { %31 = vsyncpa [#allocation11], 0 }
   0xd   :  { %32 = vsyncpa [#allocation10], 0 }
   0xe   :  { %33 = vsyncpa [#allocation14], 0 }
   0xf   :  { %34 = vsyncpa [#allocation17], 0 }
  0x10   :  { %35 = vsyncpa [#allocation8], 0 }
  0x11   :  { %36 = vsyncpa [#allocation20], 0 }
  0x12   :  { %37 = vsyncpa [#allocation23], 0 }
  0x13   :  { %38 = vsyncpa [#allocation26], 0 }
  0x14   :  { %39 = vsyncpa [#allocation29], 0 }
  0x15   :  { %40 = vsyncpa [#allocation32], 0 }
  0x16   :  { %41 = vsyncpa [#allocation35], 0 }
  0x17   :  { %42 = vsyncpa [#allocation38], 0 }
  0x18   :  { %43 = vsyncpa [#allocation41], 0 }
  0x19   :  { %44 = vsyncpa [#allocation9], 0  ;;  %s2404_s27 = smov [#allocation13]   ;;  %s2816_s28 = sld [smem:[#allocation60_spill]] }
  0x1a   :  { %s2405_s8 = smov [#allocation19]   ;;  %s2406_s29 = smov [#allocation22]  }
  0x1b   :  { %s107_s4 = sshll.u32 %s2405_s8, 4  ;;  %s126_s0 = sshll.u32 %s2406_s29, 4  ;;  %s108_s4 = int_to_ptr.vmem [resolvable:$true] %s107_s4  ;;  %s127_s0 = int_to_ptr.vmem [resolvable:$true] %s126_s0 }
  0x1c   :  { %s1956_s9 = scalar_lea.vmem %s108_s4, 64  ;;  %p1961_p1 = scmp.lt.s32.totalorder %s108_s4, %s108_s4 }
  0x1d   :  { %p1957_p0 = scmp.ne.s32.totalorder %s108_s4, %s1956_s9  ;;  %p1962_p2 = scmp.lt.s32.totalorder %s1956_s9, %s1956_s9 }
  0x1f   :  { %70 = dma.hbm_to_smem %s2816_s28, 16, %s2404_s27, [#allocation14]  }
  0x20   :  { %p1963_p3 = por %p1962_p2, %p1961_p1 }
  0x22   :  { %p1964_p4 = pnand %p1963_p3, %p1957_p0 }
  0x24   :  { %1967 = shalt.err (!%p1964_p4)
}
  0x25   :  { %s2817_s5 = sld [smem:[#allocation65_spill]]  ;;  %s1976_s10 = scalar_lea.vmem %s127_s0, 256 }
  0x26   :  { %p1977_p5 = scmp.ne.s32.totalorder %s127_s0, %s1976_s10  ;;  %p1981_p6 = scmp.lt.s32.totalorder %s127_s0, %s127_s0 }
  0x27   :  { %p1982_p7 = scmp.lt.s32.totalorder %s1976_s10, %s1976_s10 }
  0x29   :  { %p1983_p8 = por %p1982_p7, %p1981_p6 }
  0x2b   :  { %110 = dma.hbm_to_vmem [thread:$0]  %s2817_s5, 64, %s108_s4, [#allocation20]  }
  0x2c   :  { %p1984_p9 = pnand %p1983_p8, %p1977_p5 }
  0x2e   :  { %1987 = shalt.err (!%p1984_p9)
}
  0x2f   :  { %s2407_s6 = smov 64   ;;  %s2408_s1 = smov 4  }
  0x30   :  { %s2818_s7 = sld [smem:[#allocation67_spill]]  ;;  %s2409_s28 = smov [#allocation25]  }
  0x31   :  { %s148_s8 = sshll.u32 %s2409_s28, 4  ;;  %s2410_s4 = smov [#allocation28]   ;;  %s149_s8 = int_to_ptr.vmem [resolvable:$true] %s148_s8 }
  0x32   :  { %s170_s29 = sshll.u32 %s2410_s4, 4  ;;  %s1996_s9 = scalar_lea.vmem %s149_s8, 1024  ;;  %s171_s29 = int_to_ptr.vmem [resolvable:$true] %s170_s29 }
  0x33   :  { %p1997_p10 = scmp.ne.s32.totalorder %s149_s8, %s1996_s9  ;;  %p2001_p11 = scmp.lt.s32.totalorder %s149_s8, %s149_s8 }
  0x34   :  { %p2002_p12 = scmp.lt.s32.totalorder %s1996_s9, %s1996_s9 }
  0x36   :  { %132 = dma.hbm_to_vmem [thread:$0]  %s2818_s7, 256, %s127_s0, [#allocation23], %s2407_s6, %s2407_s6, %s2408_s1  }
  0x37   :  { %p2003_p13 = por %p2002_p12, %p2001_p11 }
  0x39   :  { %p2004_p0 = pnand %p2003_p13, %p1997_p10 }
  0x3b   :  { %2007 = shalt.err (!%p2004_p0)
}
  0x3c   :  { %154 = dma.hbm_to_vmem [thread:$0]  %s2788_s11, 1024, %s149_s8, [#allocation26], %s2407_s6, %s2407_s6, %s2408_s1  }
  0x3d   :  { %s2016_s0 = scalar_lea.vmem %s171_s29, 1024  ;;  %p2021_p2 = scmp.lt.s32.totalorder %s171_s29, %s171_s29 }
  0x3e   :  { %p2017_p1 = scmp.ne.s32.totalorder %s171_s29, %s2016_s0  ;;  %p2022_p3 = scmp.lt.s32.totalorder %s2016_s0, %s2016_s0 }
  0x40   :  { %p2023_p4 = por %p2022_p3, %p2021_p2 }
  0x42   :  { %p2024_p5 = pnand %p2023_p4, %p2017_p1 }
  0x44   :  { %2027 = shalt.err (!%p2024_p5)
}
  0x45   :  { %176 = dma.hbm_to_vmem [thread:$0]  %s2790_s13, 1024, %s171_s29, [#allocation29], %s2407_s6, %s2407_s6, %s2408_s1  }
  0x46   :  { %s2411_s27 = smov [#allocation31]   ;;  %s2412_s7 = smov [#allocation34]  }
  0x47   :  { %s193_s3 = sshll.u32 %s2411_s27, 4  ;;  %s215_s11 = sshll.u32 %s2412_s7, 4  ;;  %s194_s3 = int_to_ptr.vmem [resolvable:$true] %s193_s3  ;;  %s216_s11 = int_to_ptr.vmem [resolvable:$true] %s215_s11 }
  0x48   :  { %s2036_s28 = scalar_lea.vmem %s194_s3, 64  ;;  %p2041_p7 = scmp.lt.s32.totalorder %s194_s3, %s194_s3 }
  0x49   :  { %p2037_p6 = scmp.ne.s32.totalorder %s194_s3, %s2036_s28  ;;  %p2042_p8 = scmp.lt.s32.totalorder %s2036_s28, %s2036_s28 }
  0x4b   :  { %p2043_p9 = por %p2042_p8, %p2041_p7 }
  0x4d   :  { %p2044_p10 = pnand %p2043_p9, %p2037_p6 }
  0x4f   :  { %2047 = shalt.err (!%p2044_p10)
}
  0x50   :  { %196 = dma.hbm_to_vmem [thread:$0]  %s2792_s15, 64, %s194_s3, [#allocation32]  }
  0x51   :  { %s2056_s9 = scalar_lea.vmem %s216_s11, 16  ;;  %s2060_s13 = scalar_lea.vmem %s216_s11, 32 }
  0x52   :  { %p2057_p11 = scmp.ne.s32.totalorder %s216_s11, %s2056_s9  ;;  %p2061_p12 = scmp.lt.s32.totalorder %s216_s11, %s216_s11 }
  0x53   :  { %p2062_p13 = scmp.lt.s32.totalorder %s2060_s13, %s2056_s9 }
  0x55   :  { %p2063_p0 = por %p2062_p13, %p2061_p12 }
  0x57   :  { %p2064_p1 = pnand %p2063_p0, %p2057_p11 }
  0x59   :  { %2067 = shalt.err (!%p2064_p1)
}
  0x5a   :  { %218 = dma.hbm_to_vmem [thread:$0]  %s2794_s17, 16, %s216_s11, [#allocation35]  }
  0x5b   :  { %s2413_s2 = smov [#allocation37]   ;;  %s2414_s5 = smov [#allocation40]  }
  0x5c   :  { %s238_s0 = sshll.u32 %s2413_s2, 4  ;;  %s261_s10 = sshll.u32 %s2414_s5, 4  ;;  %s239_s0 = int_to_ptr.vmem [resolvable:$true] %s238_s0  ;;  %s262_s10 = int_to_ptr.vmem [resolvable:$true] %s261_s10 }
  0x5d   :  { %s2076_s27 = scalar_lea.vmem %s239_s0, 1024  ;;  %p2081_p3 = scmp.lt.s32.totalorder %s239_s0, %s239_s0 }
  0x5e   :  { %p2077_p2 = scmp.ne.s32.totalorder %s239_s0, %s2076_s27  ;;  %p2082_p4 = scmp.lt.s32.totalorder %s2076_s27, %s2076_s27 }
  0x60   :  { %p2083_p5 = por %p2082_p4, %p2081_p3 }
  0x62   :  { %p2084_p6 = pnand %p2083_p5, %p2077_p2 }
  0x64   :  { %2087 = shalt.err (!%p2084_p6)
}
  0x65   :  { %244 = dma.hbm_to_vmem [thread:$0]  %s2797_s20, 1024, %s239_s0, [#allocation38], %s2407_s6, %s2407_s6, %s2408_s1  }
  0x66   :  { %s2819_s11 = sld [smem:[#allocation58_spill]]  ;;  %s2096_s8 = scalar_lea.vmem %s262_s10, 16 }
  0x67   :  { %p2097_p7 = scmp.ne.s32.totalorder %s262_s10, %s2096_s8  ;;  %s2100_s4 = scalar_lea.vmem %s262_s10, 32 }
  0x68   :  { %p2101_p8 = scmp.lt.s32.totalorder %s262_s10, %s262_s10  ;;  %p2102_p9 = scmp.lt.s32.totalorder %s2100_s4, %s2096_s8 }
  0x6a   :  { %p2103_p10 = por %p2102_p9, %p2101_p8 }
  0x6c   :  { %s51_s28 = sshll.u32 %s2819_s11, 4  ;;  %p2104_p11 = pnand %p2103_p10, %p2097_p7  ;;  %s52_s28 = int_to_ptr.vmem [resolvable:$true] %s51_s28 }
  0x6e   :  { %2107 = shalt.err (!%p2104_p11)
}
  0x6f   :  { %264 = dma.hbm_to_vmem [thread:$0]  %s2799_s22, 16, %s262_s10, [#allocation41]  }
  0x70   :  { %s2108_s29 = scalar_lea.vmem %s52_s28, 16  ;;  %p2113_p13 = scmp.lt.s32.totalorder %s52_s28, %s52_s28 }
  0x71   :  { %p2109_p12 = scmp.ne.s32.totalorder %s52_s28, %s2108_s29  ;;  %p2114_p0 = scmp.lt.s32.totalorder %s2108_s29, %s2108_s29 }
  0x73   :  { %p2115_p1 = por %p2114_p0, %p2113_p13 }
  0x75   :  { %p2116_p2 = pnand %p2115_p1, %p2109_p12 }
  0x77   :  { %2119 = shalt.err (!%p2116_p2)
}
  0x78   :  { %s2415_s20 = smov [#allocation7]   ;;  %s2416_s30 = smov [#allocation12]  }
  0x79   :  { %54 = dma.vmem_to_smem %s52_s28, 16, %s2415_s20, [#allocation11]  }
  0x7a   :  { %s2820_s5 = sld [smem:[#allocation59_spill]]  ;;  %s2417_s27 = smov [#allocation15]  }
  0x7b   :  { %s2821_s17 = sld [smem:[#allocation61_spill]]  ;;  %s2418_s22 = smov [#allocation16]  }
  0x7c   :  { %s2822_s11 = sld [smem:[#allocation62_spill]]  ;;  %s2419_s8 = smov [#allocation18]  }
  0x7d   :  { %s94_s4 = sshll.u32 %s2419_s8, 4  ;;  %s95_s4 = int_to_ptr.vmem [resolvable:$true] %s94_s4 }
  0x7e   :  { %s2152_s9 = scalar_lea.vmem %s95_s4, 512  ;;  %p2157_p4 = scmp.lt.s32.totalorder %s95_s4, %s95_s4 }
  0x7f   :  { %p2153_p3 = scmp.ne.s32.totalorder %s95_s4, %s2152_s9  ;;  %p2158_p5 = scmp.lt.s32.totalorder %s2152_s9, %s2152_s9 }
  0x80   :  { %62 = dma.hbm_to_smem %s2820_s5, 16, %s2416_s30, [#allocation10]  }
  0x81   :  { %78 = dma.hbm_to_smem %s2821_s17, 16, %s2417_s27, [#allocation14]  }
  0x82   :  { %86 = dma.hbm_to_smem %s2822_s11, 16, %s2418_s22, [#allocation17]  }
  0x83   :  { %p2159_p6 = por %p2158_p5, %p2157_p4 }
  0x85   :  { %p2160_p7 = pnand %p2159_p6, %p2153_p3 }
  0x87   :  { %2163 = shalt.err (!%p2160_p7)
}
  0x88   :  { %s2420_s28 = smov 128   ;;  %s2421_s13 = smov 8  }
  0x89   :  { %s2823_s30 = sld [smem:[#allocation64_spill]]  ;;  %s2422_s2 = smov [#allocation21]  }
  0x8a   :  { %s117_s0 = sshll.u32 %s2422_s2, 4  ;;  %s2423_s5 = smov [#allocation24]   ;;  %s118_s0 = int_to_ptr.vmem [resolvable:$true] %s117_s0 }
  0x8b   :  { %s139_s27 = sshll.u32 %s2423_s5, 4  ;;  %s2172_s15 = scalar_lea.vmem %s118_s0, 16  ;;  %s140_s27 = int_to_ptr.vmem [resolvable:$true] %s139_s27 }
  0x8c   :  { %p2173_p8 = scmp.ne.s32.totalorder %s118_s0, %s2172_s15  ;;  %s2176_s3 = scalar_lea.vmem %s118_s0, 32 }
  0x8d   :  { %p2177_p9 = scmp.lt.s32.totalorder %s118_s0, %s118_s0  ;;  %p2178_p10 = scmp.lt.s32.totalorder %s2176_s3, %s2172_s15 }
  0x8f   :  { %100 = dma.hbm_to_vmem [thread:$0]  %s2823_s30, 512, %s95_s4, [#allocation8], %s2420_s28, %s2420_s28, %s2421_s13  }
  0x90   :  { %p2179_p11 = por %p2178_p10, %p2177_p9 }
  0x92   :  { %p2180_p12 = pnand %p2179_p11, %p2173_p8 }
  0x94   :  { %2183 = shalt.err (!%p2180_p12)
}
  0x95   :  { %s2824_s10 = sld [smem:[#allocation66_spill]]  ;;  %s2192_s7 = scalar_lea.vmem %s140_s27, 16 }
  0x96   :  { %p2193_p13 = scmp.ne.s32.totalorder %s140_s27, %s2192_s7  ;;  %s2196_s11 = scalar_lea.vmem %s140_s27, 32 }
  0x97   :  { %p2197_p0 = scmp.lt.s32.totalorder %s140_s27, %s140_s27  ;;  %p2198_p1 = scmp.lt.s32.totalorder %s2196_s11, %s2192_s7 }
  0x99   :  { %p2199_p2 = por %p2198_p1, %p2197_p0 }
  0x9b   :  { %120 = dma.hbm_to_vmem [thread:$0]  %s2824_s10, 16, %s118_s0, [#allocation20]  }
  0x9c   :  { %p2200_p3 = pnand %p2199_p2, %p2193_p13 }
  0x9e   :  { %2203 = shalt.err (!%p2200_p3)
}
  0x9f   :  { %s2825_s9 = sld [smem:[#allocation68_spill]]  ;;  %s2424_s28 = smov [#allocation27]  }
  0xa0   :  { %s161_s13 = sshll.u32 %s2424_s28, 4  ;;  %s2425_s29 = smov [#allocation30]   ;;  %s162_s13 = int_to_ptr.vmem [resolvable:$true] %s161_s13 }
  0xa1   :  { %s183_s20 = sshll.u32 %s2425_s29, 4  ;;  %s2212_s30 = scalar_lea.vmem %s162_s13, 16  ;;  %s184_s20 = int_to_ptr.vmem [resolvable:$true] %s183_s20 }
  0xa2   :  { %p2213_p4 = scmp.ne.s32.totalorder %s162_s13, %s2212_s30  ;;  %s2216_s2 = scalar_lea.vmem %s162_s13, 32 }
  0xa3   :  { %p2217_p5 = scmp.lt.s32.totalorder %s162_s13, %s162_s13  ;;  %p2218_p6 = scmp.lt.s32.totalorder %s2216_s2, %s2212_s30 }
  0xa5   :  { %142 = dma.hbm_to_vmem [thread:$0]  %s2825_s9, 16, %s140_s27, [#allocation23]  }
  0xa6   :  { %p2219_p7 = por %p2218_p6, %p2217_p5 }
  0xa8   :  { %p2220_p8 = pnand %p2219_p7, %p2213_p4 }
  0xaa   :  { %2223 = shalt.err (!%p2220_p8)
}
  0xab   :  { %164 = dma.hbm_to_vmem [thread:$0]  %s2789_s12, 16, %s162_s13, [#allocation26]  }
  0xac   :  { %s2232_s15 = scalar_lea.vmem %s184_s20, 16  ;;  %s2236_s27 = scalar_lea.vmem %s184_s20, 32 }
  0xad   :  { %p2233_p9 = scmp.ne.s32.totalorder %s184_s20, %s2232_s15  ;;  %p2237_p10 = scmp.lt.s32.totalorder %s184_s20, %s184_s20 }
  0xae   :  { %p2238_p11 = scmp.lt.s32.totalorder %s2236_s27, %s2232_s15 }
  0xb0   :  { %p2239_p12 = por %p2238_p11, %p2237_p10 }
  0xb2   :  { %p2240_p13 = pnand %p2239_p12, %p2233_p9 }
  0xb4   :  { %2243 = shalt.err (!%p2240_p13)
}
  0xb5   :  { %186 = dma.hbm_to_vmem [thread:$0]  %s2791_s14, 16, %s184_s20, [#allocation29]  }
  0xb6   :  { %s2426_s22 = smov [#allocation33]   ;;  %s2427_s7 = smov [#allocation36]  }
  0xb7   :  { %s202_s10 = sshll.u32 %s2426_s22, 4  ;;  %s224_s11 = sshll.u32 %s2427_s7, 4  ;;  %s203_s10 = int_to_ptr.vmem [resolvable:$true] %s202_s10  ;;  %s225_s11 = int_to_ptr.vmem [resolvable:$true] %s224_s11 }
  0xb8   :  { %s2252_s8 = scalar_lea.vmem %s203_s10, 1024  ;;  %p2257_p1 = scmp.lt.s32.totalorder %s203_s10, %s203_s10 }
  0xb9   :  { %p2253_p0 = scmp.ne.s32.totalorder %s203_s10, %s2252_s8  ;;  %p2258_p2 = scmp.lt.s32.totalorder %s2252_s8, %s2252_s8 }
  0xbb   :  { %p2259_p3 = por %p2258_p2, %p2257_p1 }
  0xbd   :  { %p2260_p4 = pnand %p2259_p3, %p2253_p0 }
  0xbf   :  { %2263 = shalt.err (!%p2260_p4)
}
  0xc0   :  { %208 = dma.hbm_to_vmem [thread:$0]  %s2793_s16, 1024, %s203_s10, [#allocation32], %s2407_s6, %s2407_s6, %s2408_s1  }
  0xc1   :  { %s2272_s14 = scalar_lea.vmem %s225_s11, 2048  ;;  %p2277_p6 = scmp.lt.s32.totalorder %s225_s11, %s225_s11 }
  0xc2   :  { %p2273_p5 = scmp.ne.s32.totalorder %s225_s11, %s2272_s14  ;;  %p2278_p7 = scmp.lt.s32.totalorder %s2272_s14, %s2272_s14 }
  0xc4   :  { %p2279_p8 = por %p2278_p7, %p2277_p6 }
  0xc6   :  { %p2280_p9 = pnand %p2279_p8, %p2273_p5 }
  0xc8   :  { %2283 = shalt.err (!%p2280_p9)
}
  0xc9   :  { %230 = dma.hbm_to_vmem [thread:$0]  %s2795_s18, 2048, %s225_s11, [#allocation35], %s2407_s6, %s2407_s6, %s2408_s1  }
  0xca   :  { %s2428_s13 = smov [#allocation39]   ;;  %s2429_s20 = smov [#allocation42]  }
  0xcb   :  { %s251_s29 = sshll.u32 %s2428_s13, 4  ;;  %s271_s30 = sshll.u32 %s2429_s20, 4  ;;  %s252_s29 = int_to_ptr.vmem [resolvable:$true] %s251_s29  ;;  %s272_s30 = int_to_ptr.vmem [resolvable:$true] %s271_s30 }
  0xcc   :  { %s2292_s16 = scalar_lea.vmem %s252_s29, 16  ;;  %s2296_s2 = scalar_lea.vmem %s252_s29, 32 }
  0xcd   :  { %p2293_p10 = scmp.ne.s32.totalorder %s252_s29, %s2292_s16  ;;  %p2297_p11 = scmp.lt.s32.totalorder %s252_s29, %s252_s29 }
  0xce   :  { %p2298_p12 = scmp.lt.s32.totalorder %s2296_s2, %s2292_s16 }
  0xd0   :  { %p2299_p13 = por %p2298_p12, %p2297_p11 }
  0xd2   :  { %p2300_p0 = pnand %p2299_p13, %p2293_p10 }
  0xd4   :  { %2303 = shalt.err (!%p2300_p0)
}
  0xd5   :  { %254 = dma.hbm_to_vmem [thread:$0]  %s2798_s21, 16, %s252_s29, [#allocation38]  }
  0xd6   :  { %s2312_s15 = scalar_lea.vmem %s272_s30, 16  ;;  %s2316_s18 = scalar_lea.vmem %s272_s30, 32 }
  0xd7   :  { %p2313_p1 = scmp.ne.s32.totalorder %s272_s30, %s2312_s15  ;;  %p2317_p2 = scmp.lt.s32.totalorder %s272_s30, %s272_s30 }
  0xd8   :  { %p2318_p3 = scmp.lt.s32.totalorder %s2316_s18, %s2312_s15 }
  0xda   :  { %p2319_p4 = por %p2318_p3, %p2317_p2 }
  0xdc   :  { %p2320_p5 = pnand %p2319_p4, %p2313_p1 }
  0xde   :  { %2323 = shalt.err (!%p2320_p5)
}
  0xdf   :  { %274 = dma.hbm_to_vmem [thread:$0]  %s2800_s23, 16, %s272_s30, [#allocation41]  }
  0xe0   :  { %2360 = dma.done.wait [#allocation11], 16  }
  0xe1   :  { %2361 = vsyncadd [#allocation11], 4294967280 }
  0xe2   :  { %2362 = dma.done.wait [#allocation10], 16  }
  0xe3   :  { %2363 = vsyncadd [#allocation10], 4294967280 }
  0xe4   :  { %2364 = dma.done.wait [#allocation14], 32  }
  0xe5   :  { %2365 = vsyncadd [#allocation14], 4294967264 }
  0xe6   :  { %2366 = dma.done.wait [#allocation17], 16  }
  0xe7   :  { %2367 = vsyncadd [#allocation17], 4294967280 }
  0xe8   :  { %2368 = dma.done.wait [#allocation8], 512  }
  0xe9   :  { %2369 = vsyncadd [#allocation8], 4294966784 }
  0xea   :  { %2370 = dma.done.wait [#allocation20], 80  }
  0xeb   :  { %2371 = vsyncadd [#allocation20], 4294967216 }
  0xec   :  { %2372 = dma.done.wait [#allocation23], 272  }
  0xed   :  { %2373 = vsyncadd [#allocation23], 4294967024 }
  0xee   :  { %2374 = dma.done.wait [#allocation26], 1040  }
  0xef   :  { %2375 = vsyncadd [#allocation26], 4294966256 }
  0xf0   :  { %2376 = dma.done.wait [#allocation29], 1040  }
  0xf1   :  { %2377 = vsyncadd [#allocation29], 4294966256 }
  0xf2   :  { %2378 = dma.done.wait [#allocation32], 1088  }
  0xf3   :  { %2379 = vsyncadd [#allocation32], 4294966208 }
  0xf4   :  { %2380 = dma.done.wait [#allocation35], 2064  }
  0xf5   :  { %2381 = vsyncadd [#allocation35], 4294965232 }
  0xf6   :  { %2382 = dma.done.wait [#allocation38], 1040  }
  0xf7   :  { %2383 = vsyncadd [#allocation38], 4294966256 }
  0xf8   :  { %2384 = dma.done.wait [#allocation41], 32  }
  0xf9   :  { %2385 = vsyncadd [#allocation41], 4294967264 }
  0xfa   :  { %345 = sfence }
  0xfb   :  { %v349_v0 = vld [vmem:[#allocation19] sm:$0xf]  ;;  %vm362_vm0 = vcmask 1043456   ;;  %s2826_s27 = sld [smem:[#allocation63_spill]]  ;;  %v2430_v2 = vmov 0.0   ;;  %vm2431_vm1 = vmmov 0  }
  0xfc   :  { %1665 = vmatprep.subr.bf16.mxu1 %v2430_v2  ;;  %762 = vst [vmem:[#allocation4] sm:$0xff] %v2430_v2  ;;  %763 = vst [vmem:[#allocation4 + $0x8] sm:$0xff] %v2430_v2  ;;  %v364_v3 = vsel %vm362_vm0, %v349_v0, 0  ;;  %1667 = vmatprep.mubr.msk.bf16.mxu1 %vm2431_vm1, %v2430_v2  ;;  %vm358_vm2 = vcmask 64512   ;;  %v1880_v5 = vld [vmem:[#allocation22 + $0x8] sm:$0xff]   ;;  %v1881_v7 = vld [vmem:[#allocation22] sm:$0xff]  }
  0xfd   :  { %1666 = vmatpush3.bf16.msra.mxu1 %v364_v3  ;;  %v2663_v8 = vld [vmem:[#allocation18] sm:$0xff]  ;;  %v2665_v9 = vld [vmem:[#allocation18 + $0x8] sm:$0xff]  ;;  %vm438_vm3 = vcmask 261120   ;;  %v2669_v11 = vld [vmem:[#allocation18 + $0x10] sm:$0xff]  ;;  %s2388_s22 = smov 0  }
  0xfe   :  { %1671 = vmatprep.subr.bf16.mxu1 %v1880_v5  ;;  %v417_v10 = vpack.c.bf16 %v2665_v9, %v2663_v8  ;;  %v2671_v12 = vld [vmem:[#allocation18 + $0x18] sm:$0xff]  ;;  %v1882_v13 = vld [vmem:[#allocation25 + $0x38] sm:$0xff]   ;;  %v1883_v14 = vld [vmem:[#allocation25 + $0x30] sm:$0xff]  }
  0xff   :  { %1679 = vmatprep.subr.bf16.mxu0 %v1882_v13  ;;  %v1884_v15 = vld [vmem:[#allocation25 + $0x28] sm:$0xff]   ;;  %v418_v16 = vpack.c.bf16 %v2671_v12, %v2669_v11  ;;  %v1885_v17 = vld [vmem:[#allocation25 + $0x20] sm:$0xff]   ;;  %v1886_v18 = vld [vmem:[#allocation25 + $0x18] sm:$0xff]  }
 0x100   :  { %1680 = vmatpush3.bf16.msra.mxu0 %v1882_v13  ;;  %v1887_v19 = vld [vmem:[#allocation25 + $0x10] sm:$0xff]   ;;  %v1888_v20 = vld [vmem:[#allocation25 + $0x8] sm:$0xff]   ;;  %v1889_v21 = vld [vmem:[#allocation25] sm:$0xff]  }
 0x101   :  { %v347_v1 = vld [vmem:[%s2826_s27] sm:$0xff]  ;;  %v348_v4 = vld [vmem:[%s2826_s27 + $0x8] sm:$0xff]  ;;  %1681 = vmatprep.subr.bf16.mxu0 %v1883_v14  ;;  %v1892_v24 = vld [vmem:[#allocation28 + $0x28] sm:$0xff]  }
 0x102   :  { %v350_v6 = vpack.c.bf16 %v348_v4, %v347_v1  ;;  %v1890_v22 = vld [vmem:[#allocation28 + $0x38] sm:$0xff]   ;;  %v1891_v23 = vld [vmem:[#allocation28 + $0x30] sm:$0xff]   ;;  %v1893_v25 = vld [vmem:[#allocation28 + $0x20] sm:$0xff]  }
 0x103   :  { %v1894_v26 = vld [vmem:[#allocation28 + $0x18] sm:$0xff]   ;;  %v1520_v27 = vld [vmem:[#allocation21] ss:$0 sm:$0xff]  ;;  %v1895_v49 = vld [vmem:[#allocation28 + $0x10] sm:$0xff]  }
 0x104   :  { %1668 = vmatmul.mubr.msk.bf16.vlgmr.msra.gmra.mxu1 %vm358_vm2, %v350_v6  ;;  %1682 = vmatpush3.bf16.msra.mxu0 %v1883_v14  ;;  %v1522_v36 = vld [vmem:[#allocation24] ss:$0 sm:$0xff]  ;;  %v1896_v50 = vld [vmem:[#allocation28 + $0x8] sm:$0xff]   ;;  %v1897_v51 = vld [vmem:[#allocation28] sm:$0xff]  }
 0x105   :  { %1672 = vmatpush3.bf16.msra.mxu1 %v1880_v5  ;;  %1675 = vmatprep.mubr.msk.bf16.mxu1 %vm438_vm3, %v417_v10  ;;  %v1527_v54 = vld [vmem:[#allocation27] ss:$0 sm:$0xff]  ;;  %v1536_v4 = vld [vmem:[#allocation30] ss:$0 sm:$0xff] }
 0x106   :  { %1673 = vmatprep.subr.bf16.mxu1 %v1881_v7  ;;  %1683 = vmatprep.subr.bf16.mxu0 %v1884_v15 }
 0x108   :  { %1684 = vmatpush3.bf16.msra.mxu0 %v1884_v15 }
 0x109   :  { %1674 = vmatpush3.bf16.msra.mxu1 %v1881_v7  ;;  %1685 = vmatprep.subr.bf16.mxu0 %v1885_v17 }
 0x10a   :  { %1699 = vmatprep.subr.bf16.mxu1 %v1890_v22 }
 0x10c   :  { %1676 = vmatmul.mubr.msk.bf16.vlgmr.msra.gmra.mxu1 %vm438_vm3, %v418_v16  ;;  %1686 = vmatpush3.bf16.msra.mxu0 %v1885_v17 }
 0x10d   :  { %1687 = vmatprep.subr.bf16.mxu0 %v1886_v18  ;;  %1700 = vmatpush3.bf16.msra.mxu1 %v1890_v22 }
 0x10e   :  { %1701 = vmatprep.subr.bf16.mxu1 %v1891_v23 }
 0x110   :  { %1688 = vmatpush3.bf16.msra.mxu0 %v1886_v18 }
 0x111   :  { %1689 = vmatprep.subr.bf16.mxu0 %v1887_v19  ;;  %1702 = vmatpush3.bf16.msra.mxu1 %v1891_v23 }
 0x112   :  { %1703 = vmatprep.subr.bf16.mxu1 %v1892_v24 }
 0x114   :  { %1690 = vmatpush3.bf16.msra.mxu0 %v1887_v19 }
 0x115   :  { %1691 = vmatprep.subr.bf16.mxu0 %v1888_v20  ;;  %1704 = vmatpush3.bf16.msra.mxu1 %v1892_v24 }
 0x116   :  { %1705 = vmatprep.subr.bf16.mxu1 %v1893_v25 }
 0x118   :  { %1692 = vmatpush3.bf16.msra.mxu0 %v1888_v20 }
 0x119   :  { %1693 = vmatprep.subr.bf16.mxu0 %v1889_v21  ;;  %1706 = vmatpush3.bf16.msra.mxu1 %v1893_v25 }
 0x11a   :  { %1707 = vmatprep.subr.bf16.mxu1 %v1894_v26 }
 0x11c   :  { %1694 = vmatpush3.bf16.msra.mxu0 %v1889_v21 }
 0x11d   :  { %1708 = vmatpush3.bf16.msra.mxu1 %v1894_v26 }
 0x11e   :  { %1709 = vmatprep.subr.bf16.mxu1 %v1895_v49 }
 0x121   :  { %1710 = vmatpush3.bf16.msra.mxu1 %v1895_v49 }
 0x122   :  { %1711 = vmatprep.subr.bf16.mxu1 %v1896_v50 }
 0x125   :  { %1712 = vmatpush3.bf16.msra.mxu1 %v1896_v50 }
 0x126   :  { %1713 = vmatprep.subr.bf16.mxu1 %v1897_v51 }
 0x129   :  { %1714 = vmatpush3.bf16.msra.mxu1 %v1897_v51 }
 0x1c4   :  { %v400_v28 = vpop.f32.mrf.mxu1 }
 0x1c5   :  { %v401_v29 = vadd.f32 %v1520_v27, %v400_v28 }
 0x1c6   :  { %v1669_v30 = vpop.f32.mrf.mxu1 }
 0x1c7   :  { %407 = vst [vmem:[#allocation2] sm:$0xff] %v401_v29 }
 0x1c8   :  { %v403_v31 = vpop.f32.mrf.mxu1 }
 0x1c9   :  { %v404_v32 = vadd.f32 %v1520_v27, %v403_v31 }
 0x1ca   :  { %v1670_v33 = vpop.f32.mrf.mxu1 }
 0x1cb   :  { %408 = vst [vmem:[#allocation2 + $0x8] sm:$0xff] %v404_v32 }
 0x1cc   :  { %v1677_v34 = vpop.f32.mrf.mxu1 }
 0x1cd   :  { %v488_v40 = vadd.f32 %v1677_v34, %v1522_v36 }
 0x1ce   :  { %v479_v35 = vpop.f32.mrf.mxu1 }
 0x1cf   :  { %v480_v38 = vadd.f32 %v1522_v36, %v479_v35  ;;  %v496_v46 = vmax.f32 %v488_v40, 0.0 }
 0x1d0   :  { %v1678_v37 = vpop.f32.mrf.mxu1 }
 0x1d1   :  { %v491_v39 = vadd.f32 %v1678_v37, %v1522_v36  ;;  %v494_v44 = vmax.f32 %v480_v38, 0.0 }
 0x1d2   :  { %v482_v41 = vpop.f32.mrf.mxu1 }
 0x1d3   :  { %v483_v42 = vadd.f32 %v1522_v36, %v482_v41  ;;  %v497_v43 = vmax.f32 %v491_v39, 0.0 }
 0x1d5   :  { %v495_v45 = vmax.f32 %v483_v42, 0.0  ;;  %v515_v48 = vpack.c.bf16 %v497_v43, %v496_v46 }
 0x1d7   :  { %v514_v47 = vpack.c.bf16 %v495_v45, %v494_v44 }
 0x1d9   :  { %1695 = vmatprep.mubr.bf16.mxu0 %v514_v47 }
 0x1da   :  { %1696 = vmatmul.mubr.bf16.vlgmr.msra.gmra.mxu0 %v515_v48 }
 0x29a   :  { %v1697_v52 = vpop.f32.mrf.mxu0 }
 0x29b   :  { %v614_v58 = vadd.f32 %v1697_v52, %v1527_v54 }
 0x29c   :  { %v605_v53 = vpop.f32.mrf.mxu0 }
 0x29d   :  { %v606_v56 = vadd.f32 %v1527_v54, %v605_v53  ;;  %v622_v0 = vmax.f32 %v614_v58, 0.0 }
 0x29e   :  { %v1698_v55 = vpop.f32.mrf.mxu0 }
 0x29f   :  { %v617_v57 = vadd.f32 %v1698_v55, %v1527_v54  ;;  %v620_v62 = vmax.f32 %v606_v56, 0.0 }
 0x2a0   :  { %v608_v59 = vpop.f32.mrf.mxu0 }
 0x2a1   :  { %v609_v60 = vadd.f32 %v1527_v54, %v608_v59  ;;  %v623_v61 = vmax.f32 %v617_v57, 0.0 }
 0x2a3   :  { %v621_v63 = vmax.f32 %v609_v60, 0.0  ;;  %v641_v3 = vpack.c.bf16 %v623_v61, %v622_v0 }
 0x2a5   :  { %v640_v1 = vpack.c.bf16 %v621_v63, %v620_v62 }
 0x2a7   :  { %1715 = vmatprep.mubr.bf16.mxu1 %v640_v1 }
 0x2a8   :  { %1716 = vmatmul.mubr.bf16.vlgmr.msra.gmra.mxu1 %v641_v3 }
 0x368   :  { %v1717_v5 = vpop.f32.mrf.mxu1 }
 0x369   :  { %v740_v6 = vadd.f32 %v1717_v5, %v1536_v4 }
 0x36a   :  { %v731_v7 = vpop.f32.mrf.mxu1 }
 0x36b   :  { %748 = vst [vmem:[#allocation3 + $0x10] sm:$0xff] %v740_v6  ;;  %v756_v10 = vadd.f32 %v740_v6, %v2669_v11  ;;  %v732_v13 = vadd.f32 %v1536_v4, %v731_v7 }
 0x36c   :  { %v1718_v14 = vpop.f32.mrf.mxu1 }
 0x36d   :  { %760 = vst.msk [vmem:[#allocation3 + $0x10] sm:$0xff] %vm438_vm3, %v756_v10  ;;  %746 = vst [vmem:[#allocation3] sm:$0xff] %v732_v13  ;;  %v754_v15 = vadd.f32 %v732_v13, %v2663_v8  ;;  %v743_v16 = vadd.f32 %v1718_v14, %v1536_v4 }
 0x36e   :  { %v734_v17 = vpop.f32.mrf.mxu1 }
 0x36f   :  { %758 = vst.msk [vmem:[#allocation3] sm:$0xff] %vm438_vm3, %v754_v15  ;;  %749 = vst [vmem:[#allocation3 + $0x18] sm:$0xff] %v743_v16  ;;  %v757_v18 = vadd.f32 %v743_v16, %v2671_v12  ;;  %v735_v19 = vadd.f32 %v1536_v4, %v734_v17 }
 0x371   :  { %761 = vst.msk [vmem:[#allocation3 + $0x18] sm:$0xff] %vm438_vm3, %v757_v18  ;;  %747 = vst [vmem:[#allocation3 + $0x8] sm:$0xff] %v735_v19  ;;  %v755_v11 = vadd.f32 %v735_v19, %v2665_v9 }
 0x373   :  { %759 = vst.msk [vmem:[#allocation3 + $0x8] sm:$0xff] %vm438_vm3, %v755_v11 }
 0x374 LB: > { %s770_s10 = sld [smem:[#allocation12 + %s2390_s22]]  ;;  %s772_s11 = scalar_lea.vmem [#allocation3], %s2390_s22  ;;  %s2390_s22 = sphi %s2388_s22, %s769_s22  }
 0x375   : > { %s771_s7 = sld [smem:[#allocation7 + %s2390_s22]]  ;;  %s769_s22 = sadd.s32 1, %s2390_s22  }
 0x376   : > { %p766_p6 = scmp.ge.s32.totalorder %s769_s22, 32  }
 0x377   :  { %1719 = vmatprep.subr.bf16.mxu0 (%p766_p6), %v2430_v2  ;;  %v1898_v9 = vld [vmem:[#allocation33 + $0x38] sm:$0xff] (%p766_p6)   ;;  %1735 = vmatprep.mubr.msk.bf16.mxu0 (%p766_p6), %vm2431_vm1, %v2430_v2  ;;  %898 = vst [vmem:[#allocation5] sm:$0xff] (%p766_p6), %v2430_v2  ;;  %899 = vst [vmem:[#allocation5 + $0x8] sm:$0xff] (%p766_p6), %v2430_v2  ;;  %v1899_v23 = vld [vmem:[#allocation33 + $0x30] sm:$0xff] (%p766_p6)   ;;  %s2392_s4 = smov (%p766_p6), 0  }
 0x378   :  { %1720 = vmatpush3.bf16.msra.mxu0 (%p766_p6), %v1898_v9  ;;  %v1900_v24 = vld [vmem:[#allocation33 + $0x28] sm:$0xff] (%p766_p6)   ;;  %v1901_v25 = vld [vmem:[#allocation33 + $0x20] sm:$0xff] (%p766_p6)   ;;  %v1902_v26 = vld [vmem:[#allocation33 + $0x18] sm:$0xff] (%p766_p6)  }
 0x379   :  { %1721 = vmatprep.subr.bf16.mxu0 (%p766_p6), %v2430_v2  ;;  %v1903_v27 = vld [vmem:[#allocation33 + $0x10] sm:$0xff] (%p766_p6)   ;;  %v1904_v28 = vld [vmem:[#allocation33 + $0x8] sm:$0xff] (%p766_p6)   ;;  %v1905_v29 = vld [vmem:[#allocation33] sm:$0xff] (%p766_p6)  }
 0x37a   : > { %v773_v8 = vld [vmem:[%s772_s11] sm:$0x1]  ;;  %s777_s12 = scalar_lea.vmem [#allocation4], %s770_s10  ;;  %v1545_v33 = vld [vmem:[#allocation34] ss:$0 sm:$0xff] (%p766_p6) }
 0x37b   : > { %s774_s8 = scalar_lea.vmem [#allocation31], %s771_s7  ;;  %v778_v12 = vld [vmem:[%s777_s12] sm:$0x1] }
 0x37c   : > { %v775_v20 = vld [vmem:[%s774_s8] sm:$0x1]  ;;  %1722 = vmatpush3.bf16.msra.mxu0 (%p766_p6), %v1899_v23 }
 0x37d   : > { %v776_v21 = vadd.f32 %v775_v20, %v773_v8  ;;  %768 = sbr.rel (!%p766_p6) target bundleno = 884 (0x374), region = 253  ;;  %1723 = vmatprep.subr.bf16.mxu0 (%p766_p6), %v2430_v2 }
 0x37f   : > { %v779_v22 = vadd.f32 %v778_v12, %v776_v21 }
 0x380   :  { %1724 = vmatpush3.bf16.msra.mxu0 (%p766_p6), %v1900_v24 }
 0x381   : > { %780 = vst [vmem:[%s777_s12] sm:$0x1] %v779_v22  ;;  %1725 = vmatprep.subr.bf16.mxu0 (%p766_p6), %v2430_v2 }
 0x384   :  { %1726 = vmatpush3.bf16.msra.mxu0 %v1901_v25 }
 0x385   :  { %1727 = vmatprep.subr.bf16.mxu0 %v2430_v2 }
 0x388   :  { %1728 = vmatpush3.bf16.msra.mxu0 %v1902_v26  ;;  %v781_v30 = vld [vmem:[#allocation4] sm:$0xff]  ;;  %v782_v31 = vld [vmem:[#allocation4 + $0x8] sm:$0xff] }
 0x389   :  { %1729 = vmatprep.subr.bf16.mxu0 %v2430_v2  ;;  %v799_v32 = vpack.c.bf16 %v782_v31, %v781_v30 }
 0x38c   :  { %1730 = vmatpush3.bf16.msra.mxu0 %v1903_v27 }
 0x38d   :  { %1731 = vmatprep.subr.bf16.mxu0 %v2430_v2 }
 0x390   :  { %1732 = vmatpush3.bf16.msra.mxu0 %v1904_v28 }
 0x391   :  { %1733 = vmatprep.subr.bf16.mxu0 %v2430_v2 }
 0x394   :  { %1734 = vmatpush3.bf16.msra.mxu0 %v1905_v29 }
 0x397   :  { %1736 = vmatmul.mubr.bf16.vlgmr.msra.gmra.mxu0 %v799_v32 }
 0x457   :  { %v889_v34 = vpop.f32.mrf.mxu0 }
 0x458   :  { %v890_v35 = vadd.f32 %v1545_v33, %v889_v34 }
 0x459   :  { %v1737_v36 = vpop.f32.mrf.mxu0 }
 0x45a   :  { %896 = vst [vmem:[#allocation4] sm:$0xff] %v890_v35 }
 0x45b   :  { %v892_v37 = vpop.f32.mrf.mxu0 }
 0x45c   :  { %v893_v38 = vadd.f32 %v1545_v33, %v892_v37 }
 0x45d   :  { %v1738_v39 = vpop.f32.mrf.mxu0 }
 0x45e   :  { %897 = vst [vmem:[#allocation4 + $0x8] sm:$0xff] %v893_v38 }
 0x45f LB: > { %s906_s14 = sld [smem:[#allocation13 + %s2394_s4]]  ;;  %s910_s28 = scalar_lea.vmem [#allocation4], %s2394_s4  ;;  %s2394_s4 = sphi %s2392_s4, %s905_s4  }
 0x460   : > { %s907_s9 = sld [smem:[#allocation15 + %s2394_s4]]  ;;  %s905_s4 = sadd.s32 1, %s2394_s4  }
 0x461   : > { %p902_p7 = scmp.ge.s32.totalorder %s905_s4, 16  }
 0x462   :  { %1739 = vmatprep.subr.bf16.mxu1 (%p902_p7), %v2430_v2  ;;  %v1906_v45 = vld [vmem:[#allocation36 + $0x38] sm:$0xff] (%p902_p7)   ;;  %1755 = vmatprep.mubr.msk.bf16.mxu1 (%p902_p7), %vm2431_vm1, %v2430_v2  ;;  %v1907_v46 = vld [vmem:[#allocation36 + $0x30] sm:$0xff] (%p902_p7)   ;;  %v1908_v47 = vld [vmem:[#allocation36 + $0x28] sm:$0xff] (%p902_p7)   ;;  %s2396_s16 = smov (%p902_p7), 0  }
 0x463   :  { %1740 = vmatpush3.bf16.msra.mxu1 (%p902_p7), %v1906_v45  ;;  %v1909_v50 = vld [vmem:[#allocation36 + $0x20] sm:$0xff] (%p902_p7)   ;;  %v1910_v51 = vld [vmem:[#allocation36 + $0x18] sm:$0xff] (%p902_p7)   ;;  %v1911_v52 = vld [vmem:[#allocation36 + $0x10] sm:$0xff] (%p902_p7)  }
 0x464   :  { %1741 = vmatprep.subr.bf16.mxu1 (%p902_p7), %v2430_v2  ;;  %v1912_v53 = vld [vmem:[#allocation36 + $0x8] sm:$0xff] (%p902_p7)   ;;  %v918_v55 = vld [vmem:[#allocation2 + $0x8] sm:$0xff] (%p902_p7)  ;;  %v1913_v58 = vld [vmem:[#allocation36] sm:$0xff] (%p902_p7)  }
 0x465   : > { %v911_v40 = vld [vmem:[%s910_s28] sm:$0x1]  ;;  %s908_s13 = scalar_lea.vmem [#allocation2], %s906_s14 }
 0x466   : > { %v909_v41 = vld [vmem:[%s908_s13] sm:$0x1]  ;;  %s913_s29 = scalar_lea.vmem [#allocation5], %s907_s9 }
 0x467   : > { %v912_v42 = vmul.f32 %v911_v40, %v909_v41  ;;  %v914_v43 = vld [vmem:[%s913_s29] sm:$0x1]  ;;  %904 = sbr.rel (!%p902_p7) target bundleno = 1119 (0x45f), region = 264  ;;  %1742 = vmatpush3.bf16.msra.mxu1 (%p902_p7), %v1907_v46 }
 0x468   :  { %1743 = vmatprep.subr.bf16.mxu1 (%p902_p7), %v2430_v2  ;;  %v917_v54 = vld [vmem:[#allocation2] sm:$0xff] (%p902_p7) }
 0x469   : > { %v915_v44 = vadd.f32 %v914_v43, %v912_v42  ;;  %v1554_v60 = vld [vmem:[%s2796_s19] ss:$0 sm:$0xff] (%p902_p7) }
 0x46b   : > { %916 = vst [vmem:[%s913_s29] sm:$0x1] %v915_v44  ;;  %1744 = vmatpush3.bf16.msra.mxu1 (%p902_p7), %v1908_v47 }
 0x46c   :  { %1745 = vmatprep.subr.bf16.mxu1 %v2430_v2 }
 0x46f   :  { %1746 = vmatpush3.bf16.msra.mxu1 %v1909_v50 }
 0x470   :  { %1747 = vmatprep.subr.bf16.mxu1 %v2430_v2 }
 0x472   :  { %v919_v48 = vld [vmem:[#allocation5] sm:$0xff]  ;;  %v920_v49 = vld [vmem:[#allocation5 + $0x8] sm:$0xff] }
 0x473   :  { %1040 = vst [vmem:[#allocation5] sm:$0xff] %v2430_v2  ;;  %1041 = vst [vmem:[#allocation5 + $0x8] sm:$0xff] %v2430_v2  ;;  %1748 = vmatpush3.bf16.msra.mxu1 %v1910_v51  ;;  %v921_v56 = vadd.f32 %v919_v48, %v917_v54  ;;  %v922_v57 = vadd.f32 %v920_v49, %v918_v55 }
 0x474   :  { %1749 = vmatprep.subr.bf16.mxu1 %v2430_v2 }
 0x475   :  { %v939_v59 = vpack.c.bf16 %v922_v57, %v921_v56 }
 0x477   :  { %1750 = vmatpush3.bf16.msra.mxu1 %v1911_v52 }
 0x478   :  { %1751 = vmatprep.subr.bf16.mxu1 %v2430_v2 }
 0x47b   :  { %1752 = vmatpush3.bf16.msra.mxu1 %v1912_v53 }
 0x47c   :  { %1753 = vmatprep.subr.bf16.mxu1 %v2430_v2 }
 0x47f   :  { %1754 = vmatpush3.bf16.msra.mxu1 %v1913_v58 }
 0x482   :  { %1756 = vmatmul.mubr.bf16.vlgmr.msra.gmra.mxu1 %v939_v59 }
 0x542   :  { %v1029_v61 = vpop.f32.mrf.mxu1 }
 0x543   :  { %v1030_v62 = vadd.f32 %v1554_v60, %v1029_v61 }
 0x544   :  { %v1757_v63 = vpop.f32.mrf.mxu1 }
 0x545   :  { %v1036_v0 = vmax.f32 %v1030_v62, 0.0 }
 0x546   :  { %v1032_v1 = vpop.f32.mrf.mxu1 }
 0x547   :  { %1038 = vst [vmem:[#allocation2] sm:$0xff] %v1036_v0  ;;  %v1033_v3 = vadd.f32 %v1554_v60, %v1032_v1 }
 0x548   :  { %v1758_v4 = vpop.f32.mrf.mxu1 }
 0x549   :  { %v1037_v5 = vmax.f32 %v1033_v3, 0.0 }
 0x54b   :  { %1039 = vst [vmem:[#allocation2 + $0x8] sm:$0xff] %v1037_v5 }
 0x54c LB: > { %s1048_s2 = sld [smem:[#allocation13 + %s2398_s16]]  ;;  %s1052_s5 = scalar_lea.vmem [#allocation4], %s2398_s16  ;;  %s2398_s16 = sphi %s2396_s16, %s1047_s16  }
 0x54d   : > { %s1049_s0 = sld [smem:[#allocation15 + %s2398_s16]]  ;;  %v1053_v6 = vld [vmem:[%s1052_s5] sm:$0x1]  ;;  %s1047_s16 = sadd.s32 1, %s2398_s16  }
 0x54e   : > { %p1044_p8 = scmp.ge.s32.totalorder %s1047_s16, 16  }
 0x54f   :  { %1759 = vmatprep.subr.bf16.mxu0 (%p1044_p8), %v2430_v2  ;;  %v1914_v15 = vld [vmem:[#allocation36 + $0x78] sm:$0xff] (%p1044_p8)   ;;  %1775 = vmatprep.mubr.msk.bf16.mxu0 (%p1044_p8), %vm2431_vm1, %v2430_v2  ;;  %1184 = vst [vmem:[#allocation6] sm:$0x3] (%p1044_p8), %v2430_v2  ;;  %v1915_v16 = vld [vmem:[#allocation36 + $0x70] sm:$0xff] (%p1044_p8)   ;;  %v1916_v17 = vld [vmem:[#allocation36 + $0x68] sm:$0xff] (%p1044_p8)   ;;  %s2400_s21 = smov (%p1044_p8), 0  }
 0x550   :  { %1760 = vmatpush3.bf16.msra.mxu0 (%p1044_p8), %v1914_v15  ;;  %v1917_v18 = vld [vmem:[#allocation36 + $0x60] sm:$0xff] (%p1044_p8)   ;;  %v1918_v19 = vld [vmem:[#allocation36 + $0x58] sm:$0xff] (%p1044_p8)   ;;  %v1919_v11 = vld [vmem:[#allocation36 + $0x50] sm:$0xff] (%p1044_p8)  }
 0x551   :  { %1761 = vmatprep.subr.bf16.mxu0 (%p1044_p8), %v2430_v2  ;;  %v1920_v8 = vld [vmem:[#allocation36 + $0x48] sm:$0xff] (%p1044_p8)   ;;  %v1921_v24 = vld [vmem:[#allocation36 + $0x40] sm:$0xff] (%p1044_p8)  }
 0x552   : > { %s1050_s15 = scalar_lea.vmem [#allocation2], %s1048_s2  ;;  %v1059_v20 = vld [vmem:[#allocation2] sm:$0xff] (%p1044_p8)  ;;  %v1060_v12 = vld [vmem:[#allocation2 + $0x8] sm:$0xff] (%p1044_p8) }
 0x553   : > { %v1051_v7 = vld [vmem:[%s1050_s15] sm:$0x1]  ;;  %s1055_s18 = scalar_lea.vmem [#allocation5], %s1049_s0  ;;  %v1564_v26 = vld [vmem:[%s2796_s19 + $0x1] ss:$0 sm:$0xff] (%p1044_p8) }
 0x554   : > { %v1054_v10 = vmul.f32 %v1053_v6, %v1051_v7  ;;  %v1056_v13 = vld [vmem:[%s1055_s18] sm:$0x1]  ;;  %1046 = sbr.rel (!%p1044_p8) target bundleno = 1356 (0x54c), region = 275  ;;  %1762 = vmatpush3.bf16.msra.mxu0 (%p1044_p8), %v1915_v16 }
 0x555   :  { %1763 = vmatprep.subr.bf16.mxu0 (%p1044_p8), %v2430_v2 }
 0x556   : > { %v1057_v14 = vadd.f32 %v1056_v13, %v1054_v10 }
 0x558   : > { %1058 = vst [vmem:[%s1055_s18] sm:$0x1] %v1057_v14  ;;  %1764 = vmatpush3.bf16.msra.mxu0 (%p1044_p8), %v1916_v17 }
 0x559   :  { %1765 = vmatprep.subr.bf16.mxu0 %v2430_v2 }
 0x55c   :  { %1766 = vmatpush3.bf16.msra.mxu0 %v1917_v18 }
 0x55d   :  { %1767 = vmatprep.subr.bf16.mxu0 %v2430_v2 }
 0x55f   :  { %v1061_v21 = vld [vmem:[#allocation5] sm:$0xff]  ;;  %v1062_v22 = vld [vmem:[#allocation5 + $0x8] sm:$0xff] }
 0x560   :  { %1768 = vmatpush3.bf16.msra.mxu0 %v1918_v19  ;;  %v1063_v9 = vadd.f32 %v1061_v21, %v1059_v20  ;;  %v1064_v23 = vadd.f32 %v1062_v22, %v1060_v12 }
 0x561   :  { %1769 = vmatprep.subr.bf16.mxu0 %v2430_v2 }
 0x562   :  { %v1082_v25 = vpack.c.bf16 %v1064_v23, %v1063_v9 }
 0x564   :  { %1770 = vmatpush3.bf16.msra.mxu0 %v1919_v11 }
 0x565   :  { %1771 = vmatprep.subr.bf16.mxu0 %v2430_v2 }
 0x568   :  { %1772 = vmatpush3.bf16.msra.mxu0 %v1920_v8 }
 0x569   :  { %1773 = vmatprep.subr.bf16.mxu0 %v2430_v2 }
 0x56c   :  { %1774 = vmatpush3.bf16.msra.mxu0 %v1921_v24 }
 0x56f   :  { %1776 = vmatmul.mubr.bf16.vlgmr.msra.gmra.mxu0 %v1082_v25 }
 0x62f   :  { %v1173_v27 = vpop.f32.mrf.mxu0 }
 0x630   :  { %v1174_v28 = vadd.f32 %v1564_v26, %v1173_v27 }
 0x631   :  { %v1777_v29 = vpop.f32.mrf.mxu0 }
 0x632   :  { %v1180_v30 = vmax.f32 %v1174_v28, 0.0 }
 0x633   :  { %v1176_v31 = vpop.f32.mrf.mxu0 }
 0x634   :  { %1182 = vst [vmem:[#allocation2] sm:$0xff] %v1180_v30  ;;  %v1177_v32 = vadd.f32 %v1564_v26, %v1176_v31 }
 0x635   :  { %v1778_v33 = vpop.f32.mrf.mxu0 }
 0x636   :  { %v1181_v34 = vmax.f32 %v1177_v32, 0.0 }
 0x638   :  { %1183 = vst [vmem:[#allocation2 + $0x8] sm:$0xff] %v1181_v34 }
 0x639 LB: > { %s1191_s23 = sld [smem:[#allocation16 + %s2402_s21]]  ;;  %s1194_s27 = scalar_lea.vmem [#allocation2], %s2402_s21  ;;  %s2402_s21 = sphi %s2400_s21, %s1190_s21  }
 0x63a   : > { %s1190_s21 = sadd.s32 1, %s2402_s21  }
 0x63b   : > { %p1187_p9 = scmp.ge.s32.totalorder %s1190_s21, 16  }
 0x63c   :  { %1779 = vmatprep.subr.bf16.mxu1 (%p1187_p9), %v2430_v2  ;;  %v1922_v38 = vld [vmem:[#allocation37 + $0x38] sm:$0xff] (%p1187_p9)   ;;  %1795 = vmatprep.mubr.msk.bf16.mxu1 (%p1187_p9), %vm2431_vm1, %v2430_v2  ;;  %v1923_v39 = vld [vmem:[#allocation37 + $0x30] sm:$0xff] (%p1187_p9)   ;;  %v1924_v40 = vld [vmem:[#allocation37 + $0x28] sm:$0xff] (%p1187_p9)   ;;  %v1311_v48 = vlaneseq (%p1187_p9)  ;;  %vm1317_vm5 = vcmask (%p1187_p9), 1041408  }
 0x63d   :  { %1799 = vmatprep.subr.bf16.mxu0 (%p1187_p9), %v2430_v2  ;;  %1815 = vmatprep.mubr.msk.bf16.mxu0 (%p1187_p9), %vm2431_vm1, %v2430_v2  ;;  %v1925_v41 = vld [vmem:[#allocation37 + $0x20] sm:$0xff] (%p1187_p9)   ;;  %v1926_v42 = vld [vmem:[#allocation37 + $0x18] sm:$0xff] (%p1187_p9)   ;;  %v1927_v43 = vld [vmem:[#allocation37 + $0x10] sm:$0xff] (%p1187_p9)  }
 0x63e   :  { %1780 = vmatpush3.bf16.msra.mxu1 (%p1187_p9), %v1922_v38  ;;  %v1928_v44 = vld [vmem:[#allocation37 + $0x8] sm:$0xff] (%p1187_p9)   ;;  %v1929_v45 = vld [vmem:[#allocation37] sm:$0xff] (%p1187_p9)   ;;  %v1312_v49 = vand.u32 (%p1187_p9), 127, %v1311_v48  ;;  %v1932_v4 = vld [vmem:[%s2801_s24 + $0x28] sm:$0xff] (%p1187_p9)  }
 0x63f   : > { %v1195_v35 = vld [vmem:[%s1194_s27] sm:$0x1]  ;;  %s1192_s3 = scalar_lea.vmem [#allocation6], %s1191_s23  ;;  %1189 = sbr.rel (!%p1187_p9) target bundleno = 1593 (0x639), region = 286  ;;  %1781 = vmatprep.subr.bf16.mxu1 (%p1187_p9), %v2430_v2  ;;  %v1573_v50 = vld [vmem:[#allocation39] ss:$0 sm:$0xff] (%p1187_p9) }
 0x640   : > { %v1193_v36 = vld [vmem:[%s1192_s3] sm:$0x1]  ;;  %vm1313_vm4 = vcmp.lt.s32.totalorder (%p1187_p9), %v1312_v49, 32  ;;  %v1930_v59 = vld [vmem:[%s2801_s24 + $0x38] sm:$0xff] (%p1187_p9)   ;;  %v1931_v3 = vld [vmem:[%s2801_s24 + $0x30] sm:$0xff] (%p1187_p9)  }
 0x641   : > { %v1196_v37 = vadd.f32 %v1195_v35, %v1193_v36  ;;  %v1582_v52 = vsel (%p1187_p9), %vm1313_vm4, 1.0, %v2430_v2  ;;  %1800 = vmatpush3.bf16.msra.mxu0 (%p1187_p9), %v1930_v59  ;;  %v1933_v5 = vld [vmem:[%s2801_s24 + $0x20] sm:$0xff] (%p1187_p9)   ;;  %v1934_v6 = vld [vmem:[%s2801_s24 + $0x18] sm:$0xff] (%p1187_p9)   ;;  %v1935_v7 = vld [vmem:[%s2801_s24 + $0x10] sm:$0xff] (%p1187_p9)  }
 0x642   :  { %1782 = vmatpush3.bf16.msra.mxu1 (%p1187_p9), %v1923_v39  ;;  %1801 = vmatprep.subr.bf16.mxu0 (%p1187_p9), %v2430_v2  ;;  %v1936_v10 = vld [vmem:[%s2801_s24 + $0x8] sm:$0xff] (%p1187_p9)   ;;  %v1937_v13 = vld [vmem:[%s2801_s24] sm:$0xff] (%p1187_p9)   ;;  %v1583_v18 = vld [vmem:[#allocation40] ss:$0 sm:$0xff] (%p1187_p9)  ;;  %s2432_s24 = smov (%p1187_p9), [#allocation43]  }
 0x643   : > { %1197 = vst [vmem:[%s1192_s3] sm:$0x1] %v1196_v37  ;;  %1783 = vmatprep.subr.bf16.mxu1 (%p1187_p9), %v2430_v2  ;;  %v1584_v11 = vld [vmem:[#allocation42] ss:$0 sm:$0xff] (%p1187_p9)  ;;  %v1585_v22 = vld [vmem:[%s2802_s25] ss:$0 sm:$0xff] (%p1187_p9)  ;;  %s1468_s0 = sshll.u32 (%p1187_p9), %s2432_s24, 4  ;;  %s1469_s0 = int_to_ptr.vmem [resolvable:$true] %s1468_s0 }
 0x644   :  { %s2324_s5 = scalar_lea.vmem %s1469_s0, 32  ;;  %p2329_p11 = scmp.lt.s32.totalorder %s1469_s0, %s1469_s0 }
 0x645   :  { %1802 = vmatpush3.bf16.msra.mxu0 %v1931_v3  ;;  %p2325_p10 = scmp.ne.s32.totalorder %s1469_s0, %s2324_s5  ;;  %p2330_p12 = scmp.lt.s32.totalorder %s2324_s5, %s2324_s5 }
 0x646   :  { %1784 = vmatpush3.bf16.msra.mxu1 %v1924_v40  ;;  %1803 = vmatprep.subr.bf16.mxu0 %v2430_v2 }
 0x647   :  { %1785 = vmatprep.subr.bf16.mxu1 %v2430_v2  ;;  %p2331_p13 = por %p2330_p12, %p2329_p11 }
 0x649   :  { %1804 = vmatpush3.bf16.msra.mxu0 %v1932_v4  ;;  %p2332_p0 = pnand %p2331_p13, %p2325_p10 }
 0x64a   :  { %1786 = vmatpush3.bf16.msra.mxu1 %v1925_v41  ;;  %v1198_v46 = vld [vmem:[#allocation6] sm:$0x3]  ;;  %1805 = vmatprep.subr.bf16.mxu0 %v2430_v2 }
 0x64b   :  { %1787 = vmatprep.subr.bf16.mxu1 %v2430_v2  ;;  %v1215_v47 = vpack.c.bf16 %v1198_v46, %v1198_v46 }
 0x64d   :  { %1806 = vmatpush3.bf16.msra.mxu0 %v1933_v5 }
 0x64e   :  { %1788 = vmatpush3.bf16.msra.mxu1 %v1926_v42  ;;  %1807 = vmatprep.subr.bf16.mxu0 %v2430_v2 }
 0x64f   :  { %1789 = vmatprep.subr.bf16.mxu1 %v2430_v2 }
 0x651   :  { %1808 = vmatpush3.bf16.msra.mxu0 %v1934_v6 }
 0x652   :  { %1790 = vmatpush3.bf16.msra.mxu1 %v1927_v43  ;;  %1809 = vmatprep.subr.bf16.mxu0 %v2430_v2 }
 0x653   :  { %1791 = vmatprep.subr.bf16.mxu1 %v2430_v2 }
 0x655   :  { %1810 = vmatpush3.bf16.msra.mxu0 %v1935_v7 }
 0x656   :  { %1792 = vmatpush3.bf16.msra.mxu1 %v1928_v44  ;;  %1811 = vmatprep.subr.bf16.mxu0 %v2430_v2 }
 0x657   :  { %1793 = vmatprep.subr.bf16.mxu1 %v2430_v2 }
 0x659   :  { %1812 = vmatpush3.bf16.msra.mxu0 %v1936_v10 }
 0x65a   :  { %1794 = vmatpush3.bf16.msra.mxu1 %v1929_v45  ;;  %1813 = vmatprep.subr.bf16.mxu0 %v2430_v2 }
 0x65d   :  { %1796 = vmatmul.mubr.bf16.vlgmr.msra.gmra.mxu1 %v1215_v47  ;;  %1814 = vmatpush3.bf16.msra.mxu0 %v1937_v13 }
 0x71d   :  { %v1305_v51 = vpop.f32.mrf.mxu1 }
 0x71e   :  { %v1306_v53 = vadd.f32 %v1573_v50, %v1305_v51 }
 0x71f   :  { %v1797_v54 = vpop.f32.mrf.mxu1 }
 0x720   :  { %v1316_v55 = vmul.f32 %v1582_v52, %v1306_v53 }
 0x721   :  { %v1308_v56 = vpop.f32.mrf.mxu1 }
 0x722   :  { %v1318_v57 = vsel %vm1317_vm5, %v1316_v55, 0.0 }
 0x723   :  { %1319 = vadd.xlane.f32.xlu0 %v1318_v57  ;;  %v1798_v58 = vpop.f32.mrf.mxu1 }
 0x7ac   :  { %v1320_v60 = vpop.xlane.xlu0 %1319 }
 0x7ad   :  { %v1321_v61 = vmul.f32 0.03125, %v1320_v60 }
 0x7af   :  { %v1322_v62 = vsub.f32 %v1306_v53, %v1321_v61 }
 0x7b1   :  { %v1323_v63 = vmul.f32 %v1582_v52, %v1322_v62 }
 0x7b3   :  { %v1324_v0 = vmul.f32 %v1323_v63, %v1323_v63 }
 0x7b5   :  { %v1325_v1 = vsel %vm1317_vm5, %v1324_v0, 0.0 }
 0x7b6   :  { %1326 = vadd.xlane.f32.xlu0 %v1325_v1 }
 0x83f   :  { %v1327_v14 = vpop.xlane.xlu0 %1326 }
 0x840   :  { %v1328_v15 = vmul.f32 0.03125, %v1327_v14 }
 0x842   :  { %v1329_v16 = vadd.f32 1e-05, %v1328_v15 }
 0x844   :  { %1938 = vrsqrt.f32 %v1329_v16 }
 0x851   :  { %v1939_v17 = vpop.eup %1938 }
 0x852   :  { %v1331_v19 = vmul.f32 %v1939_v17, %v1323_v63 }
 0x854   :  { %v1339_v8 = vmul.f32 %v1583_v18, %v1331_v19 }
 0x856   :  { %v1347_v20 = vadd.f32 %v1584_v11, %v1339_v8 }
 0x858   :  { %v1348_v12 = vmax.f32 %v1347_v20, 0.0 }
 0x85a   :  { %v1365_v21 = vpack.c.bf16 %v1348_v12, %v1348_v12 }
 0x85c   :  { %1816 = vmatmul.mubr.bf16.vlgmr.msra.gmra.mxu0 %v1365_v21 }
 0x91c   :  { %v1455_v2 = vpop.f32.mrf.mxu0 }
 0x91d   :  { %v1456_v9 = vadd.f32 %v1585_v22, %v1455_v2 }
 0x91e   :  { %v1817_v23 = vpop.f32.mrf.mxu0 }
 0x91f   :  { %1461 = vst [vmem:[#allocation43] sm:$0x3] %v1456_v9 }
 0x920   :  { %v1458_v24 = vpop.f32.mrf.mxu0 }
 0x921   :  { %2335 = shalt.err (!%p2332_p0)
}
 0x922   :  { %1471 = dma.vmem_to_hbm [thread:$0]  %s1469_s0, 32, %s2803_s26, [#allocation9]   ;;  %v1818_v25 = vpop.f32.mrf.mxu0 }
 0x923   :  { %2386 = dma.done.wait [#allocation9], 32  }
 0x924   :  { %2387 = vsyncadd [#allocation9], 4294967264 }
 0x925   :  { %1475 = vsyncpa [#allocation8], 1 }
 0x926   :  { %1476 = vsyncpa [#allocation20], 1 }
 0x927   :  { %1477 = vsyncpa [#allocation23], 1 }
 0x928   :  { %1478 = vsyncpa [#allocation26], 1 }
 0x929   :  { %1479 = vsyncpa [#allocation29], 1 }
 0x92a   :  { %1480 = vsyncpa [#allocation32], 1 }
 0x92b   :  { %1481 = vsyncpa [#allocation35], 1 }
 0x92c   :  { %1482 = vsyncpa [#allocation38], 1 }
 0x92d   :  { %1483 = vsyncpa [#allocation41], 1 }
 0x92e   :  { %1484 = vsyncpa [#allocation9], 1 }
 0x92f   :  { %1485 = vsyncpa [#allocation10], 1 }
 0x930   :  { %1486 = vsyncpa [#allocation14], 1 }
 0x931   :  { %1487 = vsyncpa [#allocation17], 1 }
 0x932   :  { %1488 = vsyncpa [#allocation11], 1 }

</bundles_post_ra>
